<compile_context>
chip_gen: v7x
topology: tpu7x:2x2x1
jax: 0.10.0
libtpu: 0.0.40
codegen_flags: <defaults>
</compile_context>

<pallas_src>
import functools

import jax
import jax.numpy as jnp
from jax.experimental import pallas as pl
from jax.experimental.pallas import tpu as pltpu

_EPSILON = 1e-8  # pyprob.util._epsilon
_LANE = 128


def _round_up(x, m):
    return ((x + m - 1) // m) * m


def _ff_softmax_kernel(x_ref, w1_ref, b1_ref, w2_ref, b2_ref, w3_ref, b3_ref,
                       out_ref, *, num_categories):
    """3-layer MLP (relu, relu, none) + masked softmax + epsilon, all in VMEM.

    x_ref:  (TM, D)        bf16
    w*_ref: (in, out)      bf16 (zero-padded to 128-aligned dims)
    b*_ref: (1, out)       f32  (zero-padded)
    out_ref:(TM, C_pad)    f32
    """
    x = x_ref[...]  # bf16

    h = jnp.dot(x, w1_ref[...], preferred_element_type=jnp.float32) + b1_ref[...]
    h = jnp.maximum(h, 0.0)

    h = jnp.dot(h.astype(jnp.bfloat16), w2_ref[...],
                preferred_element_type=jnp.float32) + b2_ref[...]
    h = jnp.maximum(h, 0.0)

    logits = jnp.dot(h.astype(jnp.bfloat16), w3_ref[...],
                     preferred_element_type=jnp.float32) + b3_ref[...]

    # Mask padded category lanes so they contribute nothing to the softmax.
    lane = jax.lax.broadcasted_iota(jnp.int32, logits.shape, dimension=1)
    logits = jnp.where(lane < num_categories, logits, -jnp.inf)

    # softmax over the category axis (dim=1 in the PyTorch module), in f32.
    m = jnp.max(logits, axis=-1, keepdims=True)
    e = jnp.exp(logits - m)
    s = jnp.sum(e, axis=-1, keepdims=True)
    probs = e * pl.reciprocal(s, approx=False) + _EPSILON

    out_ref[...] = probs.astype(out_ref.dtype)


def init_params(key, input_dim, num_categories):
    """Deterministic PyTorch-Linear-style init (uniform +-1/sqrt(fan_in)).

    Returns f32 params in (in, out) layout at the *logical* sizes
    (H = (D + C) // 2, C = num_categories) — i.e. the PyTorch-equivalent
    parameters before any TPU-friendly padding / casting.
    """
    hidden_dim = (input_dim + num_categories) // 2  # EmbeddingFeedForward default
    dims = [(input_dim, hidden_dim), (hidden_dim, hidden_dim),
            (hidden_dim, num_categories)]
    params = {}
    for i, (fan_in, fan_out) in enumerate(dims, start=1):
        key, kw, kb = jax.random.split(key, 3)
        bound = 1.0 / (fan_in ** 0.5)
        params[f"w{i}"] = jax.random.uniform(
            kw, (fan_in, fan_out), jnp.float32, -bound, bound)
        params[f"b{i}"] = jax.random.uniform(
            kb, (1, fan_out), jnp.float32, -bound, bound)
    return params


def prepare_params(params):
    """One-time prep: zero-pad H and C up to 128-lane multiples, cast weights
    to bf16 (biases stay f32). Zero-padding + relu(0)=0 keeps results
    identical to the unpadded network; padded category logits are masked
    inside the kernel."""
    w1, b1 = params["w1"], params["b1"]
    w2, b2 = params["w2"], params["b2"]
    w3, b3 = params["w3"], params["b3"]
    D, H = w1.shape
    C = w3.shape[1]
    H_pad = _round_up(H, _LANE)
    C_pad = _round_up(C, _LANE)

    def pad(a, rows, cols):
        return jnp.pad(a, ((0, rows - a.shape[0]), (0, cols - a.shape[1])))

    prep = {
        "w1": pad(w1, D, H_pad).astype(jnp.bfloat16),
        "b1": pad(b1, 1, H_pad).astype(jnp.float32),
        "w2": pad(w2, H_pad, H_pad).astype(jnp.bfloat16),
        "b2": pad(b2, 1, H_pad).astype(jnp.float32),
        "w3": pad(w3, H_pad, C_pad).astype(jnp.bfloat16),
        "b3": pad(b3, 1, C_pad).astype(jnp.float32),
        "num_categories": C,
    }
    return prep


def proposal_categorical_categorical_forward(x, prep):
    """Returns the `probs` of the Categorical proposal.

    x: (batch, *input_shape) — flattened to (batch, D) here (glue).
    prep: output of prepare_params (padded bf16 weights, f32 biases).
    """
    batch = x.shape[0]
    x2d = x.reshape(batch, -1).astype(jnp.bfloat16)
    D = x2d.shape[1]
    C = prep["num_categories"]
    H_pad = prep["w1"].shape[1]
    C_pad = prep["w3"].shape[1]

    # Batch tile: sublane-aligned; 128 rows per grid step once batch is large.
    TM = min(128, _round_up(batch, 8))
    B_pad = _round_up(batch, TM)
    if B_pad != batch:
        x2d = jnp.pad(x2d, ((0, B_pad - batch), (0, 0)))
    grid = (B_pad // TM,)

    kernel = functools.partial(_ff_softmax_kernel, num_categories=C)

    weight_elems = D * H_pad + H_pad * H_pad + H_pad * C_pad
    cost = pl.CostEstimate(
        flops=2 * B_pad * weight_elems,
        transcendentals=B_pad * C_pad,
        bytes_accessed=(B_pad * D * 2            # bf16 activations in
                        + weight_elems * 2       # bf16 weights
                        + (2 * H_pad + C_pad) * 4  # f32 biases
                        + B_pad * C_pad * 4),    # f32 probs out
    )

    probs_full = pl.pallas_call(
        kernel,
        out_shape=jax.ShapeDtypeStruct((B_pad, C_pad), jnp.float32),
        grid=grid,
        in_specs=[
            pl.BlockSpec((TM, D), lambda i: (i, 0)),          # x tile per step
            pl.BlockSpec((D, H_pad), lambda i: (0, 0)),       # weights resident
            pl.BlockSpec((1, H_pad), lambda i: (0, 0)),
            pl.BlockSpec((H_pad, H_pad), lambda i: (0, 0)),
            pl.BlockSpec((1, H_pad), lambda i: (0, 0)),
            pl.BlockSpec((H_pad, C_pad), lambda i: (0, 0)),
            pl.BlockSpec((1, C_pad), lambda i: (0, 0)),
        ],
        out_specs=pl.BlockSpec((TM, C_pad), lambda i: (i, 0)),
        compiler_params=pltpu.CompilerParams(
            dimension_semantics=("parallel",)),
        cost_estimate=cost,
    )(x2d, prep["w1"], prep["b1"], prep["w2"], prep["b2"],
      prep["w3"], prep["b3"])

    # Slice away batch / category padding; .view(batch, -1) of the reference
    # is a no-op here (already 2-D).
    return probs_full[:batch, :C]


def _reference_forward(x, params):
    """Pure-JAX f32 reference of the PyTorch module (for correctness check)."""
    batch = x.shape[0]
    h = x.reshape(batch, -1).astype(jnp.float32)
    h = jnp.maximum(h @ params["w1"] + params["b1"], 0.0)
    h = jnp.maximum(h @ params["w2"] + params["b2"], 0.0)
    logits = h @ params["w3"] + params["b3"]
    return jax.nn.softmax(logits, axis=1) + _EPSILON


if __name__ == "__main__":
    key = jax.random.PRNGKey(0)

    batch = 2
    input_shape = (4, 16, 16)          # per-sample observation shape
    num_categories = 16
    input_dim = 4 * 16 * 16            # 1024

    k_x, k_p = jax.random.split(key)
    x = jax.random.normal(k_x, (batch,) + input_shape, dtype=jnp.float32)
    params = init_params(k_p, input_dim, num_categories)
    prep = prepare_params(params)

    probs = proposal_categorical_categorical_forward(x, prep)
    probs = jax.block_until_ready(probs)

    assert probs.shape == (batch, num_categories)
    # each row should sum to ~1 (+ num_categories * epsilon)
    row_sums = jnp.sum(probs, axis=1)
    assert bool(jnp.all(jnp.abs(row_sums - 1.0) < 1e-3))
    assert bool(jnp.all(probs > 0.0))

    # loose comparison against the f32 reference (bf16 weights => ~1e-3 level)
    ref = _reference_forward(x, params)
    assert bool(jnp.max(jnp.abs(probs - ref)) < 5e-2)

    print("KERNEL_OK")
</pallas_src>

<mosaic_0001>
module attributes {stable_mosaic.version = 11 : i64} {
  func.func @_ff_softmax_kernel(%arg0: i32, %arg1: memref<8x1024xbf16, #tpu.memory_space<vmem>>, %arg2: memref<1024x640xbf16, #tpu.memory_space<vmem>>, %arg3: memref<1x640xf32, #tpu.memory_space<vmem>>, %arg4: memref<640x640xbf16, #tpu.memory_space<vmem>>, %arg5: memref<1x640xf32, #tpu.memory_space<vmem>>, %arg6: memref<640x128xbf16, #tpu.memory_space<vmem>>, %arg7: memref<1x128xf32, #tpu.memory_space<vmem>>, %arg8: memref<8x128xf32, #tpu.memory_space<vmem>>) attributes {dimension_semantics = [#tpu.dimension_semantics<parallel>], iteration_bounds = array<i64: 1>, scalar_prefetch = 0 : i64, scratch_operands = 0 : i64, tpu.core_type = #tpu.core_type<tc>, window_params = [{transform_indices = @transform_0, window_bounds = array<i64: 8, 1024>}, {pipeline_mode = #tpu.pipeline_mode<synchronous>, transform_indices = @transform_1, window_bounds = array<i64: 1024, 640>}, {pipeline_mode = #tpu.pipeline_mode<synchronous>, transform_indices = @transform_2, window_bounds = array<i64: 1, 640>}, {pipeline_mode = #tpu.pipeline_mode<synchronous>, transform_indices = @transform_3, window_bounds = array<i64: 640, 640>}, {pipeline_mode = #tpu.pipeline_mode<synchronous>, transform_indices = @transform_4, window_bounds = array<i64: 1, 640>}, {pipeline_mode = #tpu.pipeline_mode<synchronous>, transform_indices = @transform_5, window_bounds = array<i64: 640, 128>}, {pipeline_mode = #tpu.pipeline_mode<synchronous>, transform_indices = @transform_6, window_bounds = array<i64: 1, 128>}, {transform_indices = @transform_7, window_bounds = array<i64: 8, 128>}]} {
    %c0 = arith.constant 0 : index
    %c0_0 = arith.constant 0 : index
    %0 = vector.load %arg1[%c0, %c0_0] : memref<8x1024xbf16, #tpu.memory_space<vmem>>, vector<8x1024xbf16>
    %c0_1 = arith.constant 0 : index
    %c0_2 = arith.constant 0 : index
    %1 = vector.load %arg2[%c0_1, %c0_2] : memref<1024x640xbf16, #tpu.memory_space<vmem>>, vector<1024x640xbf16>
    %cst = arith.constant dense<0.000000e+00> : vector<8x640xf32>
    %2 = tpu.matmul %0, %1, %cst {dimension_numbers = #tpu.dot_dimension_numbers<[1], [0], [0], [1], [0, 0, 1, 1], [], []>} : vector<8x1024xbf16>, vector<1024x640xbf16>, vector<8x640xf32> -> vector<8x640xf32>
    %c0_3 = arith.constant 0 : index
    %c0_4 = arith.constant 0 : index
    %3 = vector.load %arg3[%c0_3, %c0_4] : memref<1x640xf32, #tpu.memory_space<vmem>>, vector<1x640xf32>
    %4 = vector.broadcast %3 : vector<1x640xf32> to vector<8x640xf32>
    %5 = arith.addf %2, %4 : vector<8x640xf32>
    %cst_5 = arith.constant 0.000000e+00 : f32
    %6 = vector.broadcast %cst_5 : f32 to vector<8x640xf32>
    %7 = arith.maximumf %5, %6 : vector<8x640xf32>
    %8 = arith.truncf %7 : vector<8x640xf32> to vector<8x640xbf16>
    %c0_6 = arith.constant 0 : index
    %c0_7 = arith.constant 0 : index
    %9 = vector.load %arg4[%c0_6, %c0_7] : memref<640x640xbf16, #tpu.memory_space<vmem>>, vector<640x640xbf16>
    %cst_8 = arith.constant dense<0.000000e+00> : vector<8x640xf32>
    %10 = tpu.matmul %8, %9, %cst_8 {dimension_numbers = #tpu.dot_dimension_numbers<[1], [0], [0], [1], [0, 0, 1, 1], [], []>} : vector<8x640xbf16>, vector<640x640xbf16>, vector<8x640xf32> -> vector<8x640xf32>
    %c0_9 = arith.constant 0 : index
    %c0_10 = arith.constant 0 : index
    %11 = vector.load %arg5[%c0_9, %c0_10] : memref<1x640xf32, #tpu.memory_space<vmem>>, vector<1x640xf32>
    %12 = vector.broadcast %11 : vector<1x640xf32> to vector<8x640xf32>
    %13 = arith.addf %10, %12 : vector<8x640xf32>
    %cst_11 = arith.constant 0.000000e+00 : f32
    %14 = vector.broadcast %cst_11 : f32 to vector<8x640xf32>
    %15 = arith.maximumf %13, %14 : vector<8x640xf32>
    %16 = arith.truncf %15 : vector<8x640xf32> to vector<8x640xbf16>
    %c0_12 = arith.constant 0 : index
    %c0_13 = arith.constant 0 : index
    %17 = vector.load %arg6[%c0_12, %c0_13] : memref<640x128xbf16, #tpu.memory_space<vmem>>, vector<640x128xbf16>
    %cst_14 = arith.constant dense<0.000000e+00> : vector<8x128xf32>
    %18 = tpu.matmul %16, %17, %cst_14 {dimension_numbers = #tpu.dot_dimension_numbers<[1], [0], [0], [1], [0, 0, 1, 1], [], []>} : vector<8x640xbf16>, vector<640x128xbf16>, vector<8x128xf32> -> vector<8x128xf32>
    %c0_15 = arith.constant 0 : index
    %c0_16 = arith.constant 0 : index
    %19 = vector.load %arg7[%c0_15, %c0_16] : memref<1x128xf32, #tpu.memory_space<vmem>>, vector<1x128xf32>
    %20 = vector.broadcast %19 : vector<1x128xf32> to vector<8x128xf32>
    %21 = arith.addf %18, %20 : vector<8x128xf32>
    %22 = tpu.iota {dimensions = array<i32: 1>} : vector<8x128xi32>
    %c16_i32 = arith.constant 16 : i32
    %23 = vector.broadcast %c16_i32 : i32 to vector<8x128xi32>
    %24 = arith.cmpi slt, %22, %23 : vector<8x128xi32>
    %cst_17 = arith.constant 0xFF800000 : f32
    %25 = vector.broadcast %cst_17 : f32 to vector<8x128xf32>
    %26 = arith.select %24, %21, %25 : vector<8x128xi1>, vector<8x128xf32>
    %cst_18 = arith.constant dense<0xFF800000> : vector<8xf32>
    %27 = vector.multi_reduction <maximumf>, %26, %cst_18 [1] : vector<8x128xf32> to vector<8xf32>
    %28 = vector.shape_cast %27 : vector<8xf32> to vector<8x1xf32>
    %29 = vector.broadcast %28 : vector<8x1xf32> to vector<8x128xf32>
    %30 = arith.subf %26, %29 : vector<8x128xf32>
    %31 = math.exp %30 : vector<8x128xf32>
    %cst_19 = arith.constant dense<0.000000e+00> : vector<8xf32>
    %32 = vector.multi_reduction <add>, %31, %cst_19 [1] : vector<8x128xf32> to vector<8xf32>
    %33 = vector.shape_cast %32 : vector<8xf32> to vector<8x1xf32>
    %34 = tpu.reciprocal %33 : vector<8x1xf32> -> vector<8x1xf32>
    %35 = vector.broadcast %34 : vector<8x1xf32> to vector<8x128xf32>
    %36 = arith.mulf %31, %35 : vector<8x128xf32>
    %cst_20 = arith.constant 9.99999993E-9 : f32
    %37 = vector.broadcast %cst_20 : f32 to vector<8x128xf32>
    %38 = arith.addf %36, %37 : vector<8x128xf32>
    %c0_21 = arith.constant 0 : index
    %c0_22 = arith.constant 0 : index
    %39 = vector.load %arg8[%c0_21, %c0_22] : memref<8x128xf32, #tpu.memory_space<vmem>>, vector<8x128xf32>
    tpu.vector_store %arg8[%c0_21, %c0_22], %38 {strides = array<i32>} : memref<8x128xf32, #tpu.memory_space<vmem>>, vector<8x128xf32>,
    return
  }
  func.func @transform_0(%arg0: i32) -> (i32, i32) {
    %c0_i32 = arith.constant 0 : i32
    %c0_i32_0 = arith.constant 0 : i32
    return %arg0, %c0_i32 : i32, i32
  }
  func.func @transform_1(%arg0: i32) -> (i32, i32) {
    %c0_i32 = arith.constant 0 : i32
    %c0_i32_0 = arith.constant 0 : i32
    %c0_i32_1 = arith.constant 0 : i32
    return %c0_i32, %c0_i32_0 : i32, i32
  }
  func.func @transform_2(%arg0: i32) -> (i32, i32) {
    %c0_i32 = arith.constant 0 : i32
    %c0_i32_0 = arith.constant 0 : i32
    %c0_i32_1 = arith.constant 0 : i32
    return %c0_i32, %c0_i32_0 : i32, i32
  }
  func.func @transform_3(%arg0: i32) -> (i32, i32) {
    %c0_i32 = arith.constant 0 : i32
    %c0_i32_0 = arith.constant 0 : i32
    %c0_i32_1 = arith.constant 0 : i32
    return %c0_i32, %c0_i32_0 : i32, i32
  }
  func.func @transform_4(%arg0: i32) -> (i32, i32) {
    %c0_i32 = arith.constant 0 : i32
    %c0_i32_0 = arith.constant 0 : i32
    %c0_i32_1 = arith.constant 0 : i32
    return %c0_i32, %c0_i32_0 : i32, i32
  }
  func.func @transform_5(%arg0: i32) -> (i32, i32) {
    %c0_i32 = arith.constant 0 : i32
    %c0_i32_0 = arith.constant 0 : i32
    %c0_i32_1 = arith.constant 0 : i32
    return %c0_i32, %c0_i32_0 : i32, i32
  }
  func.func @transform_6(%arg0: i32) -> (i32, i32) {
    %c0_i32 = arith.constant 0 : i32
    %c0_i32_0 = arith.constant 0 : i32
    %c0_i32_1 = arith.constant 0 : i32
    return %c0_i32, %c0_i32_0 : i32, i32
  }
  func.func @transform_7(%arg0: i32) -> (i32, i32) {
    %c0_i32 = arith.constant 0 : i32
    %c0_i32_0 = arith.constant 0 : i32
    return %arg0, %c0_i32 : i32, i32
  }
}

</mosaic_0001>

<bundles_post_ra>
// kernel: tpu_custom_call.1
= control target key start
LH: loop header
LB: loop body
LE: loop exit
PB: predicated region body
PF: predicated region fallthrough
CT: control target
= control target key end

     0   :  { %12 = vsyncpa [#allocation3], 0  ;;  %s7014_s0 = inlined_call_operand.hbm [shape: bf16[8,1024], index: 0, kind: input, shape index: {}]   ;;  %s7015_s1 = inlined_call_operand.hbm [shape: bf16[1024,640], index: 1, kind: input, shape index: {}]   ;;  %s7016_s2 = inlined_call_operand.hbm [shape: f32[1,640], index: 2, kind: input, shape index: {}]   ;;  %s7017_s3 = inlined_call_operand.hbm [shape: bf16[640,640], index: 3, kind: input, shape index: {}]   ;;  %s7018_s4 = inlined_call_operand.hbm [shape: f32[1,640], index: 4, kind: input, shape index: {}]   ;;  %s7019_s5 = inlined_call_operand.hbm [shape: bf16[640,128], index: 5, kind: input, shape index: {}]   ;;  %s7020_s6 = inlined_call_operand.hbm [shape: f32[1,128], index: 6, kind: input, shape index: {}]   ;;  %s7021_s7 = inlined_call_operand.hbm [shape: f32[8,128], index: 7, kind: output, shape index: {}]  }
   0x1   :  { %13 = vsyncpa [#allocation6], 0 }
   0x2   :  { %14 = vsyncpa [#allocation9], 0 }
   0x3   :  { %15 = vsyncpa [#allocation12], 0 }
   0x4   :  { %16 = vsyncpa [#allocation4], 0  ;;  %s6715_s24 = smov [#allocation5]   ;;  %s6529_s28 = scalar_lea.hbm %s7015_s1, 40960 }
   0x5   :  { %s32_s25 = sshll.u32 %s6715_s24, 4  ;;  %p6530_p0 = scmp.ne.s32.totalorder %s7015_s1, %s6529_s28  ;;  %s33_s25 = int_to_ptr.vmem [resolvable:$true] %s32_s25 }
   0x6   :  { %p6533_p1 = scmp.lt.u32.totalorder %s6529_s28, %s7015_s1 }
   0x8   :  { %p6535_p2 = pnand %p6533_p1, %p6530_p0 }
   0xa   :  { %6538 = shalt.err (!%p6535_p2)
}
   0xb   :  { %s6539_s10 = scalar_lea.vmem %s33_s25, 40960  ;;  %p6544_p4 = scmp.lt.s32.totalorder %s33_s25, %s33_s25 }
   0xc   :  { %p6540_p3 = scmp.ne.s32.totalorder %s33_s25, %s6539_s10  ;;  %p6545_p5 = scmp.lt.s32.totalorder %s6539_s10, %s6539_s10 }
   0xe   :  { %p6546_p6 = por %p6545_p5, %p6544_p4 }
  0x10   :  { %p6547_p7 = pnand %p6546_p6, %p6540_p3 }
  0x12   :  { %6550 = shalt.err (!%p6547_p7)
}
  0x13   :  { %s6716_s11 = smov 320   ;;  %s6717_s12 = smov 20  }
  0x14   :  { %38 = dma.hbm_to_vmem [thread:$0]  %s7015_s1, 40960, %s33_s25, [#allocation6], %s6716_s11, %s6716_s11, %s6717_s12  }
  0x15   :  { %s6718_s15 = smov [#allocation8]   ;;  %s6719_s17 = smov [#allocation11]  }
  0x16   :  { %s54_s16 = sshll.u32 %s6718_s15, 4  ;;  %s76_s18 = sshll.u32 %s6719_s17, 4  ;;  %s55_s16 = int_to_ptr.vmem [resolvable:$true] %s54_s16  ;;  %s77_s18 = int_to_ptr.vmem [resolvable:$true] %s76_s18 }
  0x17   :  { %s6551_s21 = scalar_lea.hbm %s7017_s3, 25600 }
  0x18   :  { %p6552_p8 = scmp.ne.s32.totalorder %s7017_s3, %s6551_s21  ;;  %p6555_p9 = scmp.lt.u32.totalorder %s6551_s21, %s7017_s3 }
  0x1a   :  { %p6557_p10 = pnand %p6555_p9, %p6552_p8 }
  0x1c   :  { %6560 = shalt.err (!%p6557_p10)
}
  0x1d   :  { %s6561_s1 = scalar_lea.vmem %s55_s16, 25600  ;;  %p6566_p12 = scmp.lt.s32.totalorder %s55_s16, %s55_s16 }
  0x1e   :  { %p6562_p11 = scmp.ne.s32.totalorder %s55_s16, %s6561_s1  ;;  %p6567_p13 = scmp.lt.s32.totalorder %s6561_s1, %s6561_s1 }
  0x20   :  { %p6568_p0 = por %p6567_p13, %p6566_p12 }
  0x22   :  { %p6569_p1 = pnand %p6568_p0, %p6562_p11 }
  0x24   :  { %6572 = shalt.err (!%p6569_p1)
}
  0x25   :  { %60 = dma.hbm_to_vmem [thread:$0]  %s7017_s3, 25600, %s55_s16, [#allocation9], %s6716_s11, %s6716_s11, %s6717_s12  }
  0x26   :  { %s6573_s30 = scalar_lea.hbm %s7019_s5, 5120 }
  0x27   :  { %p6574_p2 = scmp.ne.s32.totalorder %s7019_s5, %s6573_s30  ;;  %p6577_p3 = scmp.lt.u32.totalorder %s6573_s30, %s7019_s5 }
  0x29   :  { %p6579_p4 = pnand %p6577_p3, %p6574_p2 }
  0x2b   :  { %6582 = shalt.err (!%p6579_p4)
}
  0x2c   :  { %s6583_s14 = scalar_lea.vmem %s77_s18, 5120  ;;  %p6588_p6 = scmp.lt.s32.totalorder %s77_s18, %s77_s18 }
  0x2d   :  { %p6584_p5 = scmp.ne.s32.totalorder %s77_s18, %s6583_s14  ;;  %p6589_p7 = scmp.lt.s32.totalorder %s6583_s14, %s6583_s14 }
  0x2f   :  { %p6590_p8 = por %p6589_p7, %p6588_p6 }
  0x31   :  { %p6591_p9 = pnand %p6590_p8, %p6584_p5 }
  0x33   :  { %6594 = shalt.err (!%p6591_p9)
}
  0x34   :  { %s6720_s3 = smov 64   ;;  %s6721_s11 = smov 4  }
  0x35   :  { %82 = dma.hbm_to_vmem [thread:$0]  %s7019_s5, 5120, %s77_s18, [#allocation12], %s6720_s3, %s6720_s3, %s6721_s11  }
  0x36   :  { %s6722_s16 = smov [#allocation2]   ;;  %s6723_s19 = smov [#allocation7]  }
  0x37   :  { %s23_s17 = sshll.u32 %s6722_s16, 4  ;;  %s45_s20 = sshll.u32 %s6723_s19, 4  ;;  %s24_s17 = int_to_ptr.vmem [resolvable:$true] %s23_s17  ;;  %s46_s20 = int_to_ptr.vmem [resolvable:$true] %s45_s20 }
  0x38   :  { %s6595_s23 = scalar_lea.hbm %s7014_s0, 512 }
  0x39   :  { %p6596_p10 = scmp.ne.s32.totalorder %s7014_s0, %s6595_s23  ;;  %p6599_p11 = scmp.lt.u32.totalorder %s6595_s23, %s7014_s0 }
  0x3b   :  { %p6601_p12 = pnand %p6599_p11, %p6596_p10 }
  0x3d   :  { %6604 = shalt.err (!%p6601_p12)
}
  0x3e   :  { %s6605_s5 = scalar_lea.vmem %s24_s17, 512  ;;  %p6610_p0 = scmp.lt.s32.totalorder %s24_s17, %s24_s17 }
  0x3f   :  { %p6606_p13 = scmp.ne.s32.totalorder %s24_s17, %s6605_s5  ;;  %p6611_p1 = scmp.lt.s32.totalorder %s6605_s5, %s6605_s5 }
  0x41   :  { %p6612_p2 = por %p6611_p1, %p6610_p0 }
  0x43   :  { %p6613_p3 = pnand %p6612_p2, %p6606_p13 }
  0x45   :  { %6616 = shalt.err (!%p6613_p3)
}
  0x46   :  { %26 = dma.hbm_to_vmem [thread:$0]  %s7014_s0, 512, %s24_s17, [#allocation3]  }
  0x47   :  { %s6617_s30 = scalar_lea.hbm %s7016_s2, 80 }
  0x48   :  { %p6618_p4 = scmp.ne.s32.totalorder %s7016_s2, %s6617_s30  ;;  %p6621_p5 = scmp.lt.u32.totalorder %s6617_s30, %s7016_s2 }
  0x4a   :  { %p6623_p6 = pnand %p6621_p5, %p6618_p4 }
  0x4c   :  { %6626 = shalt.err (!%p6623_p6)
}
  0x4d   :  { %s6627_s14 = scalar_lea.vmem %s46_s20, 80  ;;  %s6631_s3 = scalar_lea.vmem %s46_s20, 96 }
  0x4e   :  { %p6628_p7 = scmp.ne.s32.totalorder %s46_s20, %s6627_s14  ;;  %p6632_p8 = scmp.lt.s32.totalorder %s46_s20, %s46_s20 }
  0x4f   :  { %p6633_p9 = scmp.lt.s32.totalorder %s6631_s3, %s6627_s14 }
  0x51   :  { %p6634_p10 = por %p6633_p9, %p6632_p8 }
  0x53   :  { %p6635_p11 = pnand %p6634_p10, %p6628_p7 }
  0x55   :  { %6638 = shalt.err (!%p6635_p11)
}
  0x56   :  { %48 = dma.hbm_to_vmem [thread:$0]  %s7016_s2, 80, %s46_s20, [#allocation6]  }
  0x57   :  { %s6724_s12 = smov [#allocation10]   ;;  %s6725_s16 = smov [#allocation13]  }
  0x58   :  { %s67_s15 = sshll.u32 %s6724_s12, 4  ;;  %s89_s17 = sshll.u32 %s6725_s16, 4  ;;  %s68_s15 = int_to_ptr.vmem [resolvable:$true] %s67_s15  ;;  %s90_s17 = int_to_ptr.vmem [resolvable:$true] %s89_s17 }
  0x59   :  { %s6639_s22 = scalar_lea.hbm %s7018_s4, 80 }
  0x5a   :  { %p6640_p12 = scmp.ne.s32.totalorder %s7018_s4, %s6639_s22  ;;  %p6643_p13 = scmp.lt.u32.totalorder %s6639_s22, %s7018_s4 }
  0x5c   :  { %p6645_p0 = pnand %p6643_p13, %p6640_p12 }
  0x5e   :  { %6648 = shalt.err (!%p6645_p0)
}
  0x5f   :  { %s6649_s2 = scalar_lea.vmem %s68_s15, 80  ;;  %s6653_s20 = scalar_lea.vmem %s68_s15, 96 }
  0x60   :  { %p6650_p1 = scmp.ne.s32.totalorder %s68_s15, %s6649_s2  ;;  %p6654_p2 = scmp.lt.s32.totalorder %s68_s15, %s68_s15 }
  0x61   :  { %p6655_p3 = scmp.lt.s32.totalorder %s6653_s20, %s6649_s2 }
  0x63   :  { %p6656_p4 = por %p6655_p3, %p6654_p2 }
  0x65   :  { %p6657_p5 = pnand %p6656_p4, %p6650_p1 }
  0x67   :  { %6660 = shalt.err (!%p6657_p5)
}
  0x68   :  { %70 = dma.hbm_to_vmem [thread:$0]  %s7018_s4, 80, %s68_s15, [#allocation9]  }
  0x69   :  { %s6661_s28 = scalar_lea.hbm %s7020_s6, 16 }
  0x6a   :  { %p6662_p6 = scmp.ne.s32.totalorder %s7020_s6, %s6661_s28  ;;  %p6665_p7 = scmp.lt.u32.totalorder %s6661_s28, %s7020_s6 }
  0x6c   :  { %p6667_p8 = pnand %p6665_p7, %p6662_p6 }
  0x6e   :  { %6670 = shalt.err (!%p6667_p8)
}
  0x6f   :  { %s6671_s10 = scalar_lea.vmem %s90_s17, 16  ;;  %s6675_s13 = scalar_lea.vmem %s90_s17, 32 }
  0x70   :  { %p6672_p9 = scmp.ne.s32.totalorder %s90_s17, %s6671_s10  ;;  %p6676_p10 = scmp.lt.s32.totalorder %s90_s17, %s90_s17 }
  0x71   :  { %p6677_p11 = scmp.lt.s32.totalorder %s6675_s13, %s6671_s10 }
  0x73   :  { %p6678_p12 = por %p6677_p11, %p6676_p10 }
  0x75   :  { %p6679_p13 = pnand %p6678_p12, %p6672_p9 }
  0x77   :  { %6682 = shalt.err (!%p6679_p13)
}
  0x78   :  { %92 = dma.hbm_to_vmem [thread:$0]  %s7020_s6, 16, %s90_s17, [#allocation12]  }
  0x79   :  { %6705 = dma.done.wait [#allocation3], 512  }
  0x7a   :  { %6706 = vsyncadd [#allocation3], 4294966784 }
  0x7b   :  { %6707 = dma.done.wait [#allocation6], 41040  }
  0x7c   :  { %6708 = vsyncadd [#allocation6], 4294926256 }
  0x7d   :  { %6709 = dma.done.wait [#allocation9], 25680  }
  0x7e   :  { %6710 = vsyncadd [#allocation9], 4294941616 }
  0x7f   :  { %6711 = dma.done.wait [#allocation12], 5136  }
  0x80   :  { %6712 = vsyncadd [#allocation12], 4294962160  ;;  %v5749_v0 = vld [vmem:[#allocation5 + $0x4] ss:$20 sps:$4 sm:$0xff]   ;;  %v5751_v1 = vld [vmem:[#allocation5 + $0xc] ss:$20 sps:$4 sm:$0xff]  }
  0x81   :  { %2222 = vmatprep.subr.bf16.mxu0 %v5749_v0  ;;  %v5753_v2 = vld [vmem:[#allocation5] ss:$20 sps:$4 sm:$0xff]   ;;  %v5754_v3 = vld [vmem:[#allocation5 + $0x8] ss:$20 sps:$4 sm:$0xff]   ;;  %2386 = vmatprep.subr.bf16.mxu1 %v5751_v1  ;;  %v5760_v7 = vld [vmem:[#allocation5 + $0x30] ss:$20 sps:$4 sm:$0xff]  }
  0x82   :  { %v5755_v4 = vld [vmem:[#allocation5 + $0x2c] ss:$20 sps:$4 sm:$0xff]   ;;  %2223 = vmatpush1.bf16.msra.mxu0 %v5753_v2  ;;  %2387 = vmatpush1.bf16.msra.mxu1 %v5754_v3  ;;  %v5757_v5 = vld [vmem:[#allocation5 + $0x34] ss:$20 sps:$4 sm:$0xff]   ;;  %v5763_v9 = vld [vmem:[#allocation5 + $0x5c] ss:$20 sps:$4 sm:$0xff]  }
  0x83   :  { %v5759_v6 = vld [vmem:[#allocation5 + $0x28] ss:$20 sps:$4 sm:$0xff]   ;;  %2224 = vmatprep.subr.bf16.mxu0 %v5755_v4  ;;  %2388 = vmatprep.subr.bf16.mxu1 %v5757_v5  ;;  %v5765_v10 = vld [vmem:[#allocation5 + $0x50] ss:$20 sps:$4 sm:$0xff]   ;;  %v5766_v11 = vld [vmem:[#allocation5 + $0x58] ss:$20 sps:$4 sm:$0xff]  }
  0x84   :  { %v5761_v8 = vld [vmem:[#allocation5 + $0x54] ss:$20 sps:$4 sm:$0xff]   ;;  %v5767_v12 = vld [vmem:[#allocation5 + $0x7c] ss:$20 sps:$4 sm:$0xff]   ;;  %v5769_v13 = vld [vmem:[#allocation5 + $0x84] ss:$20 sps:$4 sm:$0xff]  }
  0x85   :  { %v5771_v14 = vld [vmem:[#allocation5 + $0x78] ss:$20 sps:$4 sm:$0xff]   ;;  %v5772_v15 = vld [vmem:[#allocation5 + $0x80] ss:$20 sps:$4 sm:$0xff]   ;;  %v5778_v19 = vld [vmem:[#allocation5 + $0xa8] ss:$20 sps:$4 sm:$0xff]  }
  0x86   :  { %2225 = vmatpush1.bf16.msra.mxu0 %v5759_v6  ;;  %2389 = vmatpush1.bf16.msra.mxu1 %v5760_v7  ;;  %v5773_v16 = vld [vmem:[#allocation5 + $0xa4] ss:$20 sps:$4 sm:$0xff]   ;;  %v5775_v17 = vld [vmem:[#allocation5 + $0xac] ss:$20 sps:$4 sm:$0xff]   ;;  %v5781_v21 = vld [vmem:[#allocation5 + $0xd4] ss:$20 sps:$4 sm:$0xff]  }
  0x87   :  { %2226 = vmatprep.subr.bf16.mxu0 %v5761_v8  ;;  %2390 = vmatprep.subr.bf16.mxu1 %v5763_v9  ;;  %v5777_v18 = vld [vmem:[#allocation5 + $0xa0] ss:$20 sps:$4 sm:$0xff]   ;;  %v5783_v22 = vld [vmem:[#allocation5 + $0xc8] ss:$20 sps:$4 sm:$0xff]   ;;  %v5784_v23 = vld [vmem:[#allocation5 + $0xd0] ss:$20 sps:$4 sm:$0xff]  }
  0x88   :  { %v5779_v20 = vld [vmem:[#allocation5 + $0xcc] ss:$20 sps:$4 sm:$0xff]   ;;  %v5785_v24 = vld [vmem:[#allocation5 + $0xf4] ss:$20 sps:$4 sm:$0xff]   ;;  %v5787_v25 = vld [vmem:[#allocation5 + $0xfc] ss:$20 sps:$4 sm:$0xff]  }
  0x89   :  { %v5789_v26 = vld [vmem:[#allocation5 + $0xf0] ss:$20 sps:$4 sm:$0xff]   ;;  %v5790_v27 = vld [vmem:[#allocation5 + $0xf8] ss:$20 sps:$4 sm:$0xff]   ;;  %v5796_v31 = vld [vmem:[#allocation5 + $0x120] ss:$20 sps:$4 sm:$0xff]  }
  0x8a   :  { %2227 = vmatpush1.bf16.msra.mxu0 %v5765_v10  ;;  %2391 = vmatpush1.bf16.msra.mxu1 %v5766_v11  ;;  %v5791_v28 = vld [vmem:[#allocation5 + $0x11c] ss:$20 sps:$4 sm:$0xff]   ;;  %v5793_v29 = vld [vmem:[#allocation5 + $0x124] ss:$20 sps:$4 sm:$0xff]   ;;  %v5799_v33 = vld [vmem:[#allocation5 + $0x14c] ss:$20 sps:$4 sm:$0xff]  }
  0x8b   :  { %2228 = vmatprep.subr.bf16.mxu0 %v5767_v12  ;;  %2392 = vmatprep.subr.bf16.mxu1 %v5769_v13  ;;  %v5795_v30 = vld [vmem:[#allocation5 + $0x118] ss:$20 sps:$4 sm:$0xff]   ;;  %v5801_v34 = vld [vmem:[#allocation5 + $0x140] ss:$20 sps:$4 sm:$0xff]   ;;  %v5802_v35 = vld [vmem:[#allocation5 + $0x148] ss:$20 sps:$4 sm:$0xff]  }
  0x8c   :  { %v5797_v32 = vld [vmem:[#allocation5 + $0x144] ss:$20 sps:$4 sm:$0xff]   ;;  %v5803_v36 = vld [vmem:[#allocation5 + $0x16c] ss:$20 sps:$4 sm:$0xff]   ;;  %v5805_v37 = vld [vmem:[#allocation5 + $0x174] ss:$20 sps:$4 sm:$0xff]  }
  0x8d   :  { %v5807_v38 = vld [vmem:[#allocation5 + $0x168] ss:$20 sps:$4 sm:$0xff]   ;;  %v5808_v39 = vld [vmem:[#allocation5 + $0x170] ss:$20 sps:$4 sm:$0xff]   ;;  %v5814_v43 = vld [vmem:[#allocation5 + $0x198] ss:$20 sps:$4 sm:$0xff]  }
  0x8e   :  { %2229 = vmatpush1.bf16.msra.mxu0 %v5771_v14  ;;  %2393 = vmatpush1.bf16.msra.mxu1 %v5772_v15  ;;  %v5809_v40 = vld [vmem:[#allocation5 + $0x194] ss:$20 sps:$4 sm:$0xff]   ;;  %v5811_v41 = vld [vmem:[#allocation5 + $0x19c] ss:$20 sps:$4 sm:$0xff]   ;;  %v5817_v45 = vld [vmem:[#allocation5 + $0x1c4] ss:$20 sps:$4 sm:$0xff]  }
  0x8f   :  { %2230 = vmatprep.subr.bf16.mxu0 %v5773_v16  ;;  %2394 = vmatprep.subr.bf16.mxu1 %v5775_v17  ;;  %v5813_v42 = vld [vmem:[#allocation5 + $0x190] ss:$20 sps:$4 sm:$0xff]   ;;  %v5819_v47 = vld [vmem:[#allocation5 + $0x1b8] ss:$20 sps:$4 sm:$0xff]   ;;  %v5820_v49 = vld [vmem:[#allocation5 + $0x1c0] ss:$20 sps:$4 sm:$0xff]  }
  0x90   :  { %v5815_v44 = vld [vmem:[#allocation5 + $0x1bc] ss:$20 sps:$4 sm:$0xff]   ;;  %v115_v46 = vld [vmem:[#allocation2] sm:$0xff]  ;;  %v5829_v55 = vld [vmem:[#allocation5 + $0x214] ss:$20 sps:$4 sm:$0xff]   ;;  %vm6728_vm0 = vmmov 0  }
  0x91   :  { %v6854_v48 = vcombine.high %v115_v46, %v115_v46  ;;  %v5821_v50 = vld [vmem:[#allocation5 + $0x1e4] ss:$20 sps:$4 sm:$0xff]   ;;  %v5823_v51 = vld [vmem:[#allocation5 + $0x1ec] ss:$20 sps:$4 sm:$0xff]   ;;  %v5826_v53 = vld [vmem:[#allocation5 + $0x1e8] ss:$20 sps:$4 sm:$0xff]   ;;  %v6858_v5 = vcombine.low %v115_v46, %v115_v46 }
  0x92   :  { %2231 = vmatpush1.bf16.msra.mxu0 %v5777_v18  ;;  %2395 = vmatpush1.bf16.msra.mxu1 %v5778_v19  ;;  %v5825_v52 = vld [vmem:[#allocation5 + $0x1e0] ss:$20 sps:$4 sm:$0xff]   ;;  %v5831_v56 = vld [vmem:[#allocation5 + $0x208] ss:$20 sps:$4 sm:$0xff]   ;;  %v5832_v57 = vld [vmem:[#allocation5 + $0x210] ss:$20 sps:$4 sm:$0xff]  }
  0x93   :  { %2232 = vmatprep.subr.bf16.mxu0 %v5779_v20  ;;  %2396 = vmatprep.subr.bf16.mxu1 %v5781_v21  ;;  %v5827_v54 = vld [vmem:[#allocation5 + $0x20c] ss:$20 sps:$4 sm:$0xff]   ;;  %v5833_v58 = vld [vmem:[#allocation5 + $0x234] ss:$20 sps:$4 sm:$0xff]   ;;  %v5835_v59 = vld [vmem:[#allocation5 + $0x23c] ss:$20 sps:$4 sm:$0xff]  }
  0x94   :  { %2254 = vmatprep.mubr.bf16.mxu0 %v6854_v48  ;;  %2418 = vmatprep.mubr.bf16.mxu1 %v6854_v48  ;;  %v5837_v60 = vld [vmem:[#allocation5 + $0x230] ss:$20 sps:$4 sm:$0xff]   ;;  %v5838_v61 = vld [vmem:[#allocation5 + $0x238] ss:$20 sps:$4 sm:$0xff]   ;;  %v5844_v1 = vld [vmem:[#allocation5 + $0x260] ss:$20 sps:$4 sm:$0xff]  }
  0x95   :  { %v5839_v62 = vld [vmem:[#allocation5 + $0x25c] ss:$20 sps:$4 sm:$0xff]   ;;  %v5841_v63 = vld [vmem:[#allocation5 + $0x264] ss:$20 sps:$4 sm:$0xff]   ;;  %v5851_v3 = vld [vmem:[#allocation5 + $0x28c] ss:$20 sps:$4 sm:$0xff]  }
  0x96   :  { %2233 = vmatpush1.bf16.msra.mxu0 %v5783_v22  ;;  %2397 = vmatpush1.bf16.msra.mxu1 %v5784_v23  ;;  %v5843_v0 = vld [vmem:[#allocation5 + $0x258] ss:$20 sps:$4 sm:$0xff]   ;;  %v5846_v4 = vld [vmem:[#allocation5 + $0x280] ss:$20 sps:$4 sm:$0xff]   ;;  %v5849_v6 = vld [vmem:[#allocation5 + $0x288] ss:$20 sps:$4 sm:$0xff]  }
  0x97   :  { %2234 = vmatprep.subr.bf16.mxu0 %v5785_v24  ;;  %2398 = vmatprep.subr.bf16.mxu1 %v5787_v25  ;;  %v5848_v2 = vld [vmem:[#allocation5 + $0x284] ss:$20 sps:$4 sm:$0xff]   ;;  %v5855_v7 = vld [vmem:[#allocation5 + $0x2ac] ss:$20 sps:$4 sm:$0xff]   ;;  %v5858_v8 = vld [vmem:[#allocation5 + $0x2b4] ss:$20 sps:$4 sm:$0xff]  }
  0x98   :  { %v5853_v9 = vld [vmem:[#allocation5 + $0x2a8] ss:$20 sps:$4 sm:$0xff]   ;;  %v5856_v10 = vld [vmem:[#allocation5 + $0x2b0] ss:$20 sps:$4 sm:$0xff]   ;;  %v5862_v14 = vld [vmem:[#allocation5 + $0x2d8] ss:$20 sps:$4 sm:$0xff]  }
  0x99   :  { %v5861_v11 = vld [vmem:[#allocation5 + $0x2d4] ss:$20 sps:$4 sm:$0xff]   ;;  %v5864_v12 = vld [vmem:[#allocation5 + $0x2dc] ss:$20 sps:$4 sm:$0xff]   ;;  %v5870_v16 = vld [vmem:[#allocation5 + $0x304] ss:$20 sps:$4 sm:$0xff]  }
  0x9a   :  { %2235 = vmatpush1.bf16.msra.mxu0 %v5789_v26  ;;  %2399 = vmatpush1.bf16.msra.mxu1 %v5790_v27  ;;  %v5859_v13 = vld [vmem:[#allocation5 + $0x2d0] ss:$20 sps:$4 sm:$0xff]   ;;  %v5865_v17 = vld [vmem:[#allocation5 + $0x2f8] ss:$20 sps:$4 sm:$0xff]   ;;  %v5868_v18 = vld [vmem:[#allocation5 + $0x300] ss:$20 sps:$4 sm:$0xff]  }
  0x9b   :  { %2236 = vmatprep.subr.bf16.mxu0 %v5791_v28  ;;  %2400 = vmatprep.subr.bf16.mxu1 %v5793_v29  ;;  %v5867_v15 = vld [vmem:[#allocation5 + $0x2fc] ss:$20 sps:$4 sm:$0xff]   ;;  %v5873_v19 = vld [vmem:[#allocation5 + $0x324] ss:$20 sps:$4 sm:$0xff]   ;;  %v5876_v20 = vld [vmem:[#allocation5 + $0x32c] ss:$20 sps:$4 sm:$0xff]  }
  0x9c   :  { %v5871_v21 = vld [vmem:[#allocation5 + $0x320] ss:$20 sps:$4 sm:$0xff]   ;;  %v5874_v22 = vld [vmem:[#allocation5 + $0x328] ss:$20 sps:$4 sm:$0xff]   ;;  %v5880_v26 = vld [vmem:[#allocation5 + $0x350] ss:$20 sps:$4 sm:$0xff]  }
  0x9d   :  { %v5879_v23 = vld [vmem:[#allocation5 + $0x34c] ss:$20 sps:$4 sm:$0xff]   ;;  %v5882_v24 = vld [vmem:[#allocation5 + $0x354] ss:$20 sps:$4 sm:$0xff]   ;;  %v5888_v28 = vld [vmem:[#allocation5 + $0x37c] ss:$20 sps:$4 sm:$0xff]  }
  0x9e   :  { %2237 = vmatpush1.bf16.msra.mxu0 %v5795_v30  ;;  %2401 = vmatpush1.bf16.msra.mxu1 %v5796_v31  ;;  %v5877_v25 = vld [vmem:[#allocation5 + $0x348] ss:$20 sps:$4 sm:$0xff]   ;;  %v5883_v31 = vld [vmem:[#allocation5 + $0x370] ss:$20 sps:$4 sm:$0xff]   ;;  %s6729_s6 = smov [#allocation14]  }
  0x9f   :  { %2238 = vmatprep.subr.bf16.mxu0 %v5797_v32  ;;  %2402 = vmatprep.subr.bf16.mxu1 %v5799_v33  ;;  %v5885_v27 = vld [vmem:[#allocation5 + $0x374] ss:$20 sps:$4 sm:$0xff]   ;;  %v5886_v32 = vld [vmem:[#allocation5 + $0x378] ss:$20 sps:$4 sm:$0xff]   ;;  %v5891_v33 = vld [vmem:[#allocation5 + $0x39c] ss:$20 sps:$4 sm:$0xff]  }
  0xa0   :  { %v6862_v29 = vld [vmem:[#allocation2 + $0x8] sm:$0xff]  ;;  %v5912_v46 = vld [vmem:[#allocation5 + $0x41c] ss:$20 sps:$4 sm:$0xff]   ;;  %s4871_s3 = sshll.u32 %s6729_s6, 4  ;;  %s4872_s3 = int_to_ptr.vmem [resolvable:$true] %s4871_s3 }
  0xa1   :  { %v6866_v30 = vcombine.high %v6862_v29, %v6862_v29  ;;  %s6683_s0 = scalar_lea.vmem %s4872_s3, 128  ;;  %p6688_p1 = scmp.lt.s32.totalorder %s4872_s3, %s4872_s3 }
  0xa2   :  { %2239 = vmatpush1.bf16.msra.mxu0 %v5801_v34  ;;  %2403 = vmatpush1.bf16.msra.mxu1 %v5802_v35  ;;  %v5894_v34 = vld [vmem:[#allocation5 + $0x3a4] ss:$20 sps:$4 sm:$0xff]   ;;  %p6684_p0 = scmp.ne.s32.totalorder %s4872_s3, %s6683_s0  ;;  %p6689_p2 = scmp.lt.s32.totalorder %s6683_s0, %s6683_s0 }
  0xa3   :  { %2240 = vmatprep.subr.bf16.mxu0 %v5803_v36  ;;  %2404 = vmatprep.subr.bf16.mxu1 %v5805_v37  ;;  %v5889_v35 = vld [vmem:[#allocation5 + $0x398] ss:$20 sps:$4 sm:$0xff]   ;;  %v5892_v36 = vld [vmem:[#allocation5 + $0x3a0] ss:$20 sps:$4 sm:$0xff]  }
  0xa4   :  { %v5897_v37 = vld [vmem:[#allocation5 + $0x3c4] ss:$20 sps:$4 sm:$0xff]   ;;  %p6690_p3 = por %p6689_p2, %p6688_p1 }
  0xa6   :  { %2241 = vmatpush1.bf16.msra.mxu0 %v5807_v38  ;;  %2405 = vmatpush1.bf16.msra.mxu1 %v5808_v39  ;;  %v5900_v38 = vld [vmem:[#allocation5 + $0x3cc] ss:$20 sps:$4 sm:$0xff]   ;;  %p6691_p4 = pnand %p6690_p3, %p6684_p0 }
  0xa7   :  { %2242 = vmatprep.subr.bf16.mxu0 %v5809_v40  ;;  %2406 = vmatprep.subr.bf16.mxu1 %v5811_v41  ;;  %v5895_v39 = vld [vmem:[#allocation5 + $0x3c0] ss:$20 sps:$4 sm:$0xff]   ;;  %v5898_v40 = vld [vmem:[#allocation5 + $0x3c8] ss:$20 sps:$4 sm:$0xff]  }
  0xa8   :  { %v5903_v41 = vld [vmem:[#allocation5 + $0x3ec] ss:$20 sps:$4 sm:$0xff]  }
  0xaa   :  { %2243 = vmatpush1.bf16.msra.mxu0 %v5813_v42  ;;  %2407 = vmatpush1.bf16.msra.mxu1 %v5814_v43  ;;  %v5906_v42 = vld [vmem:[#allocation5 + $0x3f4] ss:$20 sps:$4 sm:$0xff]  }
  0xab   :  { %2244 = vmatprep.subr.bf16.mxu0 %v5815_v44  ;;  %2408 = vmatprep.subr.bf16.mxu1 %v5817_v45  ;;  %v5901_v43 = vld [vmem:[#allocation5 + $0x3e8] ss:$20 sps:$4 sm:$0xff]   ;;  %v5904_v44 = vld [vmem:[#allocation5 + $0x3f0] ss:$20 sps:$4 sm:$0xff]  }
  0xac   :  { %v5909_v45 = vld [vmem:[#allocation5 + $0x414] ss:$20 sps:$4 sm:$0xff]  }
  0xae   :  { %2245 = vmatpush1.bf16.msra.mxu0 %v5819_v47  ;;  %2409 = vmatpush1.bf16.msra.mxu1 %v5820_v49  ;;  %v5907_v47 = vld [vmem:[#allocation5 + $0x410] ss:$20 sps:$4 sm:$0xff]   ;;  %v5910_v49 = vld [vmem:[#allocation5 + $0x418] ss:$20 sps:$4 sm:$0xff]  }
  0xaf   :  { %2246 = vmatprep.subr.bf16.mxu0 %v5821_v50  ;;  %2410 = vmatprep.subr.bf16.mxu1 %v5823_v51  ;;  %v5915_v50 = vld [vmem:[#allocation5 + $0x43c] ss:$20 sps:$4 sm:$0xff]   ;;  %v5918_v51 = vld [vmem:[#allocation5 + $0x444] ss:$20 sps:$4 sm:$0xff]  }
  0xb2   :  { %2247 = vmatpush1.bf16.msra.mxu0 %v5825_v52  ;;  %2411 = vmatpush1.bf16.msra.mxu1 %v5826_v53  ;;  %v5913_v52 = vld [vmem:[#allocation5 + $0x438] ss:$20 sps:$4 sm:$0xff]   ;;  %v5916_v53 = vld [vmem:[#allocation5 + $0x440] ss:$20 sps:$4 sm:$0xff]  }
  0xb3   :  { %2248 = vmatprep.subr.bf16.mxu0 %v5827_v54  ;;  %2412 = vmatprep.subr.bf16.mxu1 %v5829_v55  ;;  %v5921_v54 = vld [vmem:[#allocation5 + $0x464] ss:$20 sps:$4 sm:$0xff]   ;;  %v5924_v55 = vld [vmem:[#allocation5 + $0x46c] ss:$20 sps:$4 sm:$0xff]  }
  0xb6   :  { %2249 = vmatpush1.bf16.msra.mxu0 %v5831_v56  ;;  %2413 = vmatpush1.bf16.msra.mxu1 %v5832_v57  ;;  %v5919_v56 = vld [vmem:[#allocation5 + $0x460] ss:$20 sps:$4 sm:$0xff]   ;;  %v5922_v57 = vld [vmem:[#allocation5 + $0x468] ss:$20 sps:$4 sm:$0xff]  }
  0xb7   :  { %2250 = vmatprep.subr.bf16.mxu0 %v5833_v58  ;;  %2414 = vmatprep.subr.bf16.mxu1 %v5835_v59  ;;  %v5927_v58 = vld [vmem:[#allocation5 + $0x48c] ss:$20 sps:$4 sm:$0xff]   ;;  %v5930_v59 = vld [vmem:[#allocation5 + $0x494] ss:$20 sps:$4 sm:$0xff]  }
  0xba   :  { %2251 = vmatpush1.bf16.msra.mxu0 %v5837_v60  ;;  %2415 = vmatpush1.bf16.msra.mxu1 %v5838_v61  ;;  %v5925_v60 = vld [vmem:[#allocation5 + $0x488] ss:$20 sps:$4 sm:$0xff]   ;;  %v5928_v61 = vld [vmem:[#allocation5 + $0x490] ss:$20 sps:$4 sm:$0xff]  }
  0xbb   :  { %2252 = vmatprep.subr.bf16.mxu0 %v5839_v62  ;;  %2416 = vmatprep.subr.bf16.mxu1 %v5841_v63  ;;  %v5933_v62 = vld [vmem:[#allocation5 + $0x4b4] ss:$20 sps:$4 sm:$0xff]   ;;  %v5936_v63 = vld [vmem:[#allocation5 + $0x4bc] ss:$20 sps:$4 sm:$0xff]  }
  0xbe   :  { %2253 = vmatpush1.bf16.msra.mxu0 %v5843_v0  ;;  %2417 = vmatpush1.bf16.msra.mxu1 %v5844_v1  ;;  %v5931_v0 = vld [vmem:[#allocation5 + $0x4b0] ss:$20 sps:$4 sm:$0xff]   ;;  %v5934_v1 = vld [vmem:[#allocation5 + $0x4b8] ss:$20 sps:$4 sm:$0xff]  }
  0xbf   :  { %2263 = vmatprep.subr.bf16.mxu0 %v5848_v2  ;;  %2427 = vmatprep.subr.bf16.mxu1 %v5851_v3  ;;  %v5939_v2 = vld [vmem:[#allocation5 + $0x4dc] ss:$20 sps:$4 sm:$0xff]   ;;  %v5942_v3 = vld [vmem:[#allocation5 + $0x4e4] ss:$20 sps:$4 sm:$0xff]  }
  0xc1   :  { %2255 = vmatmul.mubr.bf16.vlgmr.msra.gmra.mrb[0].mxu0 %v6858_v5  ;;  %2419 = vmatmul.mubr.bf16.vlgmr.msra.gmra.mrb[0].mxu1 %v6858_v5 }
  0xc2   :  { %2264 = vmatpush1.bf16.msra.mxu0 %v5846_v4  ;;  %2428 = vmatpush1.bf16.msra.mxu1 %v5849_v6  ;;  %v5937_v4 = vld [vmem:[#allocation5 + $0x4d8] ss:$20 sps:$4 sm:$0xff]   ;;  %v5940_v6 = vld [vmem:[#allocation5 + $0x4e0] ss:$20 sps:$4 sm:$0xff]  }
  0xc3   :  { %2265 = vmatprep.subr.bf16.mxu0 %v5855_v7  ;;  %2429 = vmatprep.subr.bf16.mxu1 %v5858_v8  ;;  %v5947_v7 = vld [vmem:[#allocation5 + $0x504] ss:$20 sps:$4 sm:$0xff]   ;;  %v5950_v8 = vld [vmem:[#allocation5 + $0x50c] ss:$20 sps:$4 sm:$0xff]  }
  0xc4   :  { %2295 = vmatprep.mubr.bf16.mxu0 %v6866_v30  ;;  %2459 = vmatprep.mubr.bf16.mxu1 %v6866_v30 }
  0xc6   :  { %2266 = vmatpush1.bf16.msra.mxu0 %v5853_v9  ;;  %2430 = vmatpush1.bf16.msra.mxu1 %v5856_v10  ;;  %v6872_v9 = vcombine.low %v6862_v29, %v6862_v29  ;;  %v5945_v10 = vld [vmem:[#allocation5 + $0x500] ss:$20 sps:$4 sm:$0xff]   ;;  %v5972_v29 = vld [vmem:[#allocation5 + $0x5a8] ss:$20 sps:$4 sm:$0xff]  }
  0xc7   :  { %2267 = vmatprep.subr.bf16.mxu0 %v5861_v11  ;;  %2431 = vmatprep.subr.bf16.mxu1 %v5864_v12  ;;  %v5948_v11 = vld [vmem:[#allocation5 + $0x508] ss:$20 sps:$4 sm:$0xff]   ;;  %v5953_v12 = vld [vmem:[#allocation5 + $0x52c] ss:$20 sps:$4 sm:$0xff]  }
  0xca   :  { %2268 = vmatpush1.bf16.msra.mxu0 %v5859_v13  ;;  %2432 = vmatpush1.bf16.msra.mxu1 %v5862_v14  ;;  %v6874_v13 = vld [vmem:[#allocation2 + $0x10] sm:$0xff] }
  0xcb   :  { %2269 = vmatprep.subr.bf16.mxu0 %v5867_v15  ;;  %2433 = vmatprep.subr.bf16.mxu1 %v5870_v16  ;;  %v5956_v14 = vld [vmem:[#allocation5 + $0x534] ss:$20 sps:$4 sm:$0xff]   ;;  %v6878_v15 = vcombine.high %v6874_v13, %v6874_v13 }
  0xcc   :  { %v5951_v16 = vld [vmem:[#allocation5 + $0x528] ss:$20 sps:$4 sm:$0xff]  }
  0xce   :  { %2270 = vmatpush1.bf16.msra.mxu0 %v5865_v17  ;;  %2434 = vmatpush1.bf16.msra.mxu1 %v5868_v18  ;;  %v5954_v17 = vld [vmem:[#allocation5 + $0x530] ss:$20 sps:$4 sm:$0xff]   ;;  %v5959_v18 = vld [vmem:[#allocation5 + $0x554] ss:$20 sps:$4 sm:$0xff]  }
  0xcf   :  { %2271 = vmatprep.subr.bf16.mxu0 %v5873_v19  ;;  %2435 = vmatprep.subr.bf16.mxu1 %v5876_v20  ;;  %v5962_v19 = vld [vmem:[#allocation5 + $0x55c] ss:$20 sps:$4 sm:$0xff]  }
  0xd0   :  { %v5957_v20 = vld [vmem:[#allocation5 + $0x550] ss:$20 sps:$4 sm:$0xff]  }
  0xd2   :  { %2272 = vmatpush1.bf16.msra.mxu0 %v5871_v21  ;;  %2436 = vmatpush1.bf16.msra.mxu1 %v5874_v22  ;;  %v5960_v21 = vld [vmem:[#allocation5 + $0x558] ss:$20 sps:$4 sm:$0xff]   ;;  %v5965_v22 = vld [vmem:[#allocation5 + $0x57c] ss:$20 sps:$4 sm:$0xff]  }
  0xd3   :  { %2273 = vmatprep.subr.bf16.mxu0 %v5879_v23  ;;  %2437 = vmatprep.subr.bf16.mxu1 %v5882_v24  ;;  %v5968_v23 = vld [vmem:[#allocation5 + $0x584] ss:$20 sps:$4 sm:$0xff]  }
  0xd4   :  { %v5963_v24 = vld [vmem:[#allocation5 + $0x578] ss:$20 sps:$4 sm:$0xff]  }
  0xd6   :  { %2274 = vmatpush1.bf16.msra.mxu0 %v5877_v25  ;;  %2438 = vmatpush1.bf16.msra.mxu1 %v5880_v26  ;;  %v5966_v25 = vld [vmem:[#allocation5 + $0x580] ss:$20 sps:$4 sm:$0xff]   ;;  %v5971_v26 = vld [vmem:[#allocation5 + $0x5a4] ss:$20 sps:$4 sm:$0xff]  }
  0xd7   :  { %2275 = vmatprep.subr.bf16.mxu0 %v5885_v27  ;;  %2439 = vmatprep.subr.bf16.mxu1 %v5888_v28  ;;  %v5974_v27 = vld [vmem:[#allocation5 + $0x5ac] ss:$20 sps:$4 sm:$0xff]  }
  0xd8   :  { %v5969_v28 = vld [vmem:[#allocation5 + $0x5a0] ss:$20 sps:$4 sm:$0xff]  }
  0xda   :  { %2276 = vmatpush1.bf16.msra.mxu0 %v5883_v31  ;;  %2440 = vmatpush1.bf16.msra.mxu1 %v5886_v32  ;;  %v5977_v31 = vld [vmem:[#allocation5 + $0x5cc] ss:$20 sps:$4 sm:$0xff]   ;;  %v5980_v32 = vld [vmem:[#allocation5 + $0x5d4] ss:$20 sps:$4 sm:$0xff]  }
  0xdb   :  { %2277 = vmatprep.subr.bf16.mxu0 %v5891_v33  ;;  %2441 = vmatprep.subr.bf16.mxu1 %v5894_v34  ;;  %v5975_v33 = vld [vmem:[#allocation5 + $0x5c8] ss:$20 sps:$4 sm:$0xff]   ;;  %v5978_v34 = vld [vmem:[#allocation5 + $0x5d0] ss:$20 sps:$4 sm:$0xff]  }
  0xde   :  { %2278 = vmatpush1.bf16.msra.mxu0 %v5889_v35  ;;  %2442 = vmatpush1.bf16.msra.mxu1 %v5892_v36  ;;  %v5983_v35 = vld [vmem:[#allocation5 + $0x5f4] ss:$20 sps:$4 sm:$0xff]   ;;  %v5986_v36 = vld [vmem:[#allocation5 + $0x5fc] ss:$20 sps:$4 sm:$0xff]  }
  0xdf   :  { %2279 = vmatprep.subr.bf16.mxu0 %v5897_v37  ;;  %2443 = vmatprep.subr.bf16.mxu1 %v5900_v38  ;;  %v5981_v37 = vld [vmem:[#allocation5 + $0x5f0] ss:$20 sps:$4 sm:$0xff]   ;;  %v5984_v38 = vld [vmem:[#allocation5 + $0x5f8] ss:$20 sps:$4 sm:$0xff]  }
  0xe2   :  { %2280 = vmatpush1.bf16.msra.mxu0 %v5895_v39  ;;  %2444 = vmatpush1.bf16.msra.mxu1 %v5898_v40  ;;  %v5989_v39 = vld [vmem:[#allocation5 + $0x61c] ss:$20 sps:$4 sm:$0xff]   ;;  %v5992_v40 = vld [vmem:[#allocation5 + $0x624] ss:$20 sps:$4 sm:$0xff]  }
  0xe3   :  { %2281 = vmatprep.subr.bf16.mxu0 %v5903_v41  ;;  %2445 = vmatprep.subr.bf16.mxu1 %v5906_v42  ;;  %v5987_v41 = vld [vmem:[#allocation5 + $0x618] ss:$20 sps:$4 sm:$0xff]   ;;  %v5990_v42 = vld [vmem:[#allocation5 + $0x620] ss:$20 sps:$4 sm:$0xff]  }
  0xe6   :  { %2282 = vmatpush1.bf16.msra.mxu0 %v5901_v43  ;;  %2446 = vmatpush1.bf16.msra.mxu1 %v5904_v44  ;;  %v5995_v43 = vld [vmem:[#allocation5 + $0x644] ss:$20 sps:$4 sm:$0xff]   ;;  %v5998_v44 = vld [vmem:[#allocation5 + $0x64c] ss:$20 sps:$4 sm:$0xff]  }
  0xe7   :  { %2283 = vmatprep.subr.bf16.mxu0 %v5909_v45  ;;  %2447 = vmatprep.subr.bf16.mxu1 %v5912_v46  ;;  %v5993_v45 = vld [vmem:[#allocation5 + $0x640] ss:$20 sps:$4 sm:$0xff]   ;;  %v5996_v46 = vld [vmem:[#allocation5 + $0x648] ss:$20 sps:$4 sm:$0xff]  }
  0xea   :  { %2284 = vmatpush1.bf16.msra.mxu0 %v5907_v47  ;;  %2448 = vmatpush1.bf16.msra.mxu1 %v5910_v49  ;;  %v6001_v47 = vld [vmem:[#allocation5 + $0x66c] ss:$20 sps:$4 sm:$0xff]   ;;  %v6004_v49 = vld [vmem:[#allocation5 + $0x674] ss:$20 sps:$4 sm:$0xff]  }
  0xeb   :  { %2285 = vmatprep.subr.bf16.mxu0 %v5915_v50  ;;  %2449 = vmatprep.subr.bf16.mxu1 %v5918_v51  ;;  %v5999_v50 = vld [vmem:[#allocation5 + $0x668] ss:$20 sps:$4 sm:$0xff]   ;;  %v6002_v51 = vld [vmem:[#allocation5 + $0x670] ss:$20 sps:$4 sm:$0xff]  }
  0xee   :  { %2286 = vmatpush1.bf16.msra.mxu0 %v5913_v52  ;;  %2450 = vmatpush1.bf16.msra.mxu1 %v5916_v53  ;;  %v6007_v52 = vld [vmem:[#allocation5 + $0x694] ss:$20 sps:$4 sm:$0xff]   ;;  %v6010_v53 = vld [vmem:[#allocation5 + $0x69c] ss:$20 sps:$4 sm:$0xff]  }
  0xef   :  { %2287 = vmatprep.subr.bf16.mxu0 %v5921_v54  ;;  %2451 = vmatprep.subr.bf16.mxu1 %v5924_v55  ;;  %v6005_v54 = vld [vmem:[#allocation5 + $0x690] ss:$20 sps:$4 sm:$0xff]   ;;  %v6008_v55 = vld [vmem:[#allocation5 + $0x698] ss:$20 sps:$4 sm:$0xff]  }
  0xf2   :  { %2288 = vmatpush1.bf16.msra.mxu0 %v5919_v56  ;;  %2452 = vmatpush1.bf16.msra.mxu1 %v5922_v57  ;;  %v6013_v56 = vld [vmem:[#allocation5 + $0x6bc] ss:$20 sps:$4 sm:$0xff]   ;;  %v6016_v57 = vld [vmem:[#allocation5 + $0x6c4] ss:$20 sps:$4 sm:$0xff]  }
  0xf3   :  { %2289 = vmatprep.subr.bf16.mxu0 %v5927_v58  ;;  %2453 = vmatprep.subr.bf16.mxu1 %v5930_v59  ;;  %v6011_v58 = vld [vmem:[#allocation5 + $0x6b8] ss:$20 sps:$4 sm:$0xff]   ;;  %v6014_v59 = vld [vmem:[#allocation5 + $0x6c0] ss:$20 sps:$4 sm:$0xff]  }
  0xf6   :  { %2290 = vmatpush1.bf16.msra.mxu0 %v5925_v60  ;;  %2454 = vmatpush1.bf16.msra.mxu1 %v5928_v61  ;;  %v6019_v60 = vld [vmem:[#allocation5 + $0x6e4] ss:$20 sps:$4 sm:$0xff]   ;;  %v6022_v61 = vld [vmem:[#allocation5 + $0x6ec] ss:$20 sps:$4 sm:$0xff]  }
  0xf7   :  { %2291 = vmatprep.subr.bf16.mxu0 %v5933_v62  ;;  %2455 = vmatprep.subr.bf16.mxu1 %v5936_v63  ;;  %v6017_v62 = vld [vmem:[#allocation5 + $0x6e0] ss:$20 sps:$4 sm:$0xff]   ;;  %v6020_v63 = vld [vmem:[#allocation5 + $0x6e8] ss:$20 sps:$4 sm:$0xff]  }
  0xfa   :  { %2292 = vmatpush1.bf16.msra.mxu0 %v5931_v0  ;;  %2456 = vmatpush1.bf16.msra.mxu1 %v5934_v1  ;;  %v6025_v0 = vld [vmem:[#allocation5 + $0x70c] ss:$20 sps:$4 sm:$0xff]   ;;  %v6028_v1 = vld [vmem:[#allocation5 + $0x714] ss:$20 sps:$4 sm:$0xff]  }
  0xfb   :  { %2293 = vmatprep.subr.bf16.mxu0 %v5939_v2  ;;  %2457 = vmatprep.subr.bf16.mxu1 %v5942_v3  ;;  %v6023_v2 = vld [vmem:[#allocation5 + $0x708] ss:$20 sps:$4 sm:$0xff]   ;;  %v6026_v3 = vld [vmem:[#allocation5 + $0x710] ss:$20 sps:$4 sm:$0xff]  }
  0xfe   :  { %2294 = vmatpush1.bf16.msra.mxu0 %v5937_v4  ;;  %2458 = vmatpush1.bf16.msra.mxu1 %v5940_v6  ;;  %v6031_v4 = vld [vmem:[#allocation5 + $0x734] ss:$20 sps:$4 sm:$0xff]   ;;  %v6034_v6 = vld [vmem:[#allocation5 + $0x73c] ss:$20 sps:$4 sm:$0xff]  }
  0xff   :  { %2304 = vmatprep.subr.bf16.mxu0 %v5947_v7  ;;  %2468 = vmatprep.subr.bf16.mxu1 %v5950_v8  ;;  %v6029_v7 = vld [vmem:[#allocation5 + $0x730] ss:$20 sps:$4 sm:$0xff]   ;;  %v6032_v8 = vld [vmem:[#allocation5 + $0x738] ss:$20 sps:$4 sm:$0xff]  }
 0x101   :  { %2296 = vmatmul.mubr.bf16.vlgmr.msra.gmra.mrb[0].mxu0 %v6872_v9  ;;  %2460 = vmatmul.mubr.bf16.vlgmr.msra.gmra.mrb[0].mxu1 %v6872_v9 }
 0x102   :  { %2305 = vmatpush1.bf16.msra.mxu0 %v5945_v10  ;;  %2469 = vmatpush1.bf16.msra.mxu1 %v5948_v11  ;;  %v6037_v10 = vld [vmem:[#allocation5 + $0x75c] ss:$20 sps:$4 sm:$0xff]   ;;  %v6040_v11 = vld [vmem:[#allocation5 + $0x764] ss:$20 sps:$4 sm:$0xff]  }
 0x103   :  { %2306 = vmatprep.subr.bf16.mxu0 %v5953_v12  ;;  %2470 = vmatprep.subr.bf16.mxu1 %v5956_v14  ;;  %v6035_v12 = vld [vmem:[#allocation5 + $0x758] ss:$20 sps:$4 sm:$0xff]   ;;  %v6038_v14 = vld [vmem:[#allocation5 + $0x760] ss:$20 sps:$4 sm:$0xff]  }
 0x104   :  { %2336 = vmatprep.mubr.bf16.mxu0 %v6878_v15  ;;  %2500 = vmatprep.mubr.bf16.mxu1 %v6878_v15 }
 0x106   :  { %2307 = vmatpush1.bf16.msra.mxu0 %v5951_v16  ;;  %2471 = vmatpush1.bf16.msra.mxu1 %v5954_v17  ;;  %v6045_v16 = vld [vmem:[#allocation5 + $0x784] ss:$20 sps:$4 sm:$0xff]   ;;  %v6048_v17 = vld [vmem:[#allocation5 + $0x78c] ss:$20 sps:$4 sm:$0xff]  }
 0x107   :  { %2308 = vmatprep.subr.bf16.mxu0 %v5959_v18  ;;  %2472 = vmatprep.subr.bf16.mxu1 %v5962_v19  ;;  %v6043_v18 = vld [vmem:[#allocation5 + $0x780] ss:$20 sps:$4 sm:$0xff]   ;;  %v6046_v19 = vld [vmem:[#allocation5 + $0x788] ss:$20 sps:$4 sm:$0xff]  }
 0x10a   :  { %2309 = vmatpush1.bf16.msra.mxu0 %v5957_v20  ;;  %2473 = vmatpush1.bf16.msra.mxu1 %v5960_v21  ;;  %v6886_v20 = vcombine.low %v6874_v13, %v6874_v13  ;;  %v6888_v21 = vld [vmem:[#allocation2 + $0x18] sm:$0xff]  ;;  %v6057_v13 = vld [vmem:[#allocation5 + $0x7d4] ss:$20 sps:$4 sm:$0xff]  }
 0x10b   :  { %2310 = vmatprep.subr.bf16.mxu0 %v5965_v22  ;;  %2474 = vmatprep.subr.bf16.mxu1 %v5968_v23  ;;  %v6051_v22 = vld [vmem:[#allocation5 + $0x7ac] ss:$20 sps:$4 sm:$0xff]   ;;  %v6054_v23 = vld [vmem:[#allocation5 + $0x7b4] ss:$20 sps:$4 sm:$0xff]  }
 0x10e   :  { %2311 = vmatpush1.bf16.msra.mxu0 %v5963_v24  ;;  %2475 = vmatpush1.bf16.msra.mxu1 %v5966_v25  ;;  %v6049_v24 = vld [vmem:[#allocation5 + $0x7a8] ss:$20 sps:$4 sm:$0xff]   ;;  %v6892_v25 = vcombine.high %v6888_v21, %v6888_v21 }
 0x10f   :  { %2312 = vmatprep.subr.bf16.mxu0 %v5971_v26  ;;  %2476 = vmatprep.subr.bf16.mxu1 %v5974_v27  ;;  %v6052_v26 = vld [vmem:[#allocation5 + $0x7b0] ss:$20 sps:$4 sm:$0xff]  }
 0x110   :  { %v6060_v27 = vld [vmem:[#allocation5 + $0x7dc] ss:$20 sps:$4 sm:$0xff]  }
 0x112   :  { %2313 = vmatpush1.bf16.msra.mxu0 %v5969_v28  ;;  %2477 = vmatpush1.bf16.msra.mxu1 %v5972_v29  ;;  %v6055_v28 = vld [vmem:[#allocation5 + $0x7d0] ss:$20 sps:$4 sm:$0xff]   ;;  %v6058_v29 = vld [vmem:[#allocation5 + $0x7d8] ss:$20 sps:$4 sm:$0xff]  }
 0x113   :  { %2314 = vmatprep.subr.bf16.mxu0 %v5977_v31  ;;  %2478 = vmatprep.subr.bf16.mxu1 %v5980_v32  ;;  %v6063_v31 = vld [vmem:[#allocation5 + $0x7fc] ss:$20 sps:$4 sm:$0xff]   ;;  %v6066_v32 = vld [vmem:[#allocation5 + $0x804] ss:$20 sps:$4 sm:$0xff]  }
 0x116   :  { %2315 = vmatpush1.bf16.msra.mxu0 %v5975_v33  ;;  %2479 = vmatpush1.bf16.msra.mxu1 %v5978_v34  ;;  %v6061_v33 = vld [vmem:[#allocation5 + $0x7f8] ss:$20 sps:$4 sm:$0xff]   ;;  %v6064_v34 = vld [vmem:[#allocation5 + $0x800] ss:$20 sps:$4 sm:$0xff]  }
 0x117   :  { %2316 = vmatprep.subr.bf16.mxu0 %v5983_v35  ;;  %2480 = vmatprep.subr.bf16.mxu1 %v5986_v36  ;;  %v6069_v35 = vld [vmem:[#allocation5 + $0x824] ss:$20 sps:$4 sm:$0xff]   ;;  %v6072_v36 = vld [vmem:[#allocation5 + $0x82c] ss:$20 sps:$4 sm:$0xff]  }
 0x11a   :  { %2317 = vmatpush1.bf16.msra.mxu0 %v5981_v37  ;;  %2481 = vmatpush1.bf16.msra.mxu1 %v5984_v38  ;;  %v6067_v37 = vld [vmem:[#allocation5 + $0x820] ss:$20 sps:$4 sm:$0xff]   ;;  %v6070_v38 = vld [vmem:[#allocation5 + $0x828] ss:$20 sps:$4 sm:$0xff]  }
 0x11b   :  { %2318 = vmatprep.subr.bf16.mxu0 %v5989_v39  ;;  %2482 = vmatprep.subr.bf16.mxu1 %v5992_v40  ;;  %v6075_v39 = vld [vmem:[#allocation5 + $0x84c] ss:$20 sps:$4 sm:$0xff]   ;;  %v6078_v40 = vld [vmem:[#allocation5 + $0x854] ss:$20 sps:$4 sm:$0xff]  }
 0x11e   :  { %2319 = vmatpush1.bf16.msra.mxu0 %v5987_v41  ;;  %2483 = vmatpush1.bf16.msra.mxu1 %v5990_v42  ;;  %v6073_v41 = vld [vmem:[#allocation5 + $0x848] ss:$20 sps:$4 sm:$0xff]   ;;  %v6076_v42 = vld [vmem:[#allocation5 + $0x850] ss:$20 sps:$4 sm:$0xff]  }
 0x11f   :  { %2320 = vmatprep.subr.bf16.mxu0 %v5995_v43  ;;  %2484 = vmatprep.subr.bf16.mxu1 %v5998_v44  ;;  %v6081_v43 = vld [vmem:[#allocation5 + $0x874] ss:$20 sps:$4 sm:$0xff]   ;;  %v6084_v44 = vld [vmem:[#allocation5 + $0x87c] ss:$20 sps:$4 sm:$0xff]  }
 0x122   :  { %2321 = vmatpush1.bf16.msra.mxu0 %v5993_v45  ;;  %2485 = vmatpush1.bf16.msra.mxu1 %v5996_v46  ;;  %v6079_v45 = vld [vmem:[#allocation5 + $0x870] ss:$20 sps:$4 sm:$0xff]   ;;  %v6082_v46 = vld [vmem:[#allocation5 + $0x878] ss:$20 sps:$4 sm:$0xff]  }
 0x123   :  { %2322 = vmatprep.subr.bf16.mxu0 %v6001_v47  ;;  %2486 = vmatprep.subr.bf16.mxu1 %v6004_v49  ;;  %v6087_v47 = vld [vmem:[#allocation5 + $0x89c] ss:$20 sps:$4 sm:$0xff]   ;;  %v6090_v49 = vld [vmem:[#allocation5 + $0x8a4] ss:$20 sps:$4 sm:$0xff]  }
 0x126   :  { %2323 = vmatpush1.bf16.msra.mxu0 %v5999_v50  ;;  %2487 = vmatpush1.bf16.msra.mxu1 %v6002_v51  ;;  %v6085_v50 = vld [vmem:[#allocation5 + $0x898] ss:$20 sps:$4 sm:$0xff]   ;;  %v6088_v51 = vld [vmem:[#allocation5 + $0x8a0] ss:$20 sps:$4 sm:$0xff]  }
 0x127   :  { %2324 = vmatprep.subr.bf16.mxu0 %v6007_v52  ;;  %2488 = vmatprep.subr.bf16.mxu1 %v6010_v53  ;;  %v6093_v52 = vld [vmem:[#allocation5 + $0x8c4] ss:$20 sps:$4 sm:$0xff]   ;;  %v6096_v53 = vld [vmem:[#allocation5 + $0x8cc] ss:$20 sps:$4 sm:$0xff]  }
 0x12a   :  { %2325 = vmatpush1.bf16.msra.mxu0 %v6005_v54  ;;  %2489 = vmatpush1.bf16.msra.mxu1 %v6008_v55  ;;  %v6091_v54 = vld [vmem:[#allocation5 + $0x8c0] ss:$20 sps:$4 sm:$0xff]   ;;  %v6094_v55 = vld [vmem:[#allocation5 + $0x8c8] ss:$20 sps:$4 sm:$0xff]  }
 0x12b   :  { %2326 = vmatprep.subr.bf16.mxu0 %v6013_v56  ;;  %2490 = vmatprep.subr.bf16.mxu1 %v6016_v57  ;;  %v6099_v56 = vld [vmem:[#allocation5 + $0x8ec] ss:$20 sps:$4 sm:$0xff]   ;;  %v6102_v57 = vld [vmem:[#allocation5 + $0x8f4] ss:$20 sps:$4 sm:$0xff]  }
 0x12e   :  { %2327 = vmatpush1.bf16.msra.mxu0 %v6011_v58  ;;  %2491 = vmatpush1.bf16.msra.mxu1 %v6014_v59  ;;  %v6097_v58 = vld [vmem:[#allocation5 + $0x8e8] ss:$20 sps:$4 sm:$0xff]   ;;  %v6100_v59 = vld [vmem:[#allocation5 + $0x8f0] ss:$20 sps:$4 sm:$0xff]  }
 0x12f   :  { %2328 = vmatprep.subr.bf16.mxu0 %v6019_v60  ;;  %2492 = vmatprep.subr.bf16.mxu1 %v6022_v61  ;;  %v6105_v60 = vld [vmem:[#allocation5 + $0x914] ss:$20 sps:$4 sm:$0xff]   ;;  %v6108_v61 = vld [vmem:[#allocation5 + $0x91c] ss:$20 sps:$4 sm:$0xff]  }
 0x132   :  { %2329 = vmatpush1.bf16.msra.mxu0 %v6017_v62  ;;  %2493 = vmatpush1.bf16.msra.mxu1 %v6020_v63  ;;  %v6103_v62 = vld [vmem:[#allocation5 + $0x910] ss:$20 sps:$4 sm:$0xff]   ;;  %v6106_v63 = vld [vmem:[#allocation5 + $0x918] ss:$20 sps:$4 sm:$0xff]  }
 0x133   :  { %2330 = vmatprep.subr.bf16.mxu0 %v6025_v0  ;;  %2494 = vmatprep.subr.bf16.mxu1 %v6028_v1  ;;  %v6111_v0 = vld [vmem:[#allocation5 + $0x93c] ss:$20 sps:$4 sm:$0xff]   ;;  %v6114_v1 = vld [vmem:[#allocation5 + $0x944] ss:$20 sps:$4 sm:$0xff]  }
 0x136   :  { %2331 = vmatpush1.bf16.msra.mxu0 %v6023_v2  ;;  %2495 = vmatpush1.bf16.msra.mxu1 %v6026_v3  ;;  %v6109_v2 = vld [vmem:[#allocation5 + $0x938] ss:$20 sps:$4 sm:$0xff]   ;;  %v6112_v3 = vld [vmem:[#allocation5 + $0x940] ss:$20 sps:$4 sm:$0xff]  }
 0x137   :  { %2332 = vmatprep.subr.bf16.mxu0 %v6031_v4  ;;  %2496 = vmatprep.subr.bf16.mxu1 %v6034_v6  ;;  %v6117_v4 = vld [vmem:[#allocation5 + $0x964] ss:$20 sps:$4 sm:$0xff]   ;;  %v6120_v6 = vld [vmem:[#allocation5 + $0x96c] ss:$20 sps:$4 sm:$0xff]  }
 0x13a   :  { %2333 = vmatpush1.bf16.msra.mxu0 %v6029_v7  ;;  %2497 = vmatpush1.bf16.msra.mxu1 %v6032_v8  ;;  %v6115_v7 = vld [vmem:[#allocation5 + $0x960] ss:$20 sps:$4 sm:$0xff]   ;;  %v6118_v8 = vld [vmem:[#allocation5 + $0x968] ss:$20 sps:$4 sm:$0xff]  }
 0x13b   :  { %2334 = vmatprep.subr.bf16.mxu0 %v6037_v10  ;;  %2498 = vmatprep.subr.bf16.mxu1 %v6040_v11  ;;  %v6123_v10 = vld [vmem:[#allocation5 + $0x98c] ss:$20 sps:$4 sm:$0xff]   ;;  %v6126_v11 = vld [vmem:[#allocation5 + $0x994] ss:$20 sps:$4 sm:$0xff]  }
 0x13e   :  { %2335 = vmatpush1.bf16.msra.mxu0 %v6035_v12  ;;  %2499 = vmatpush1.bf16.msra.mxu1 %v6038_v14  ;;  %v6121_v12 = vld [vmem:[#allocation5 + $0x988] ss:$20 sps:$4 sm:$0xff]   ;;  %v6124_v14 = vld [vmem:[#allocation5 + $0x990] ss:$20 sps:$4 sm:$0xff]  }
 0x13f   :  { %2345 = vmatprep.subr.bf16.mxu0 %v6045_v16  ;;  %2509 = vmatprep.subr.bf16.mxu1 %v6048_v17  ;;  %v6129_v16 = vld [vmem:[#allocation5 + $0x9b4] ss:$20 sps:$4 sm:$0xff]   ;;  %v6132_v17 = vld [vmem:[#allocation5 + $0x9bc] ss:$20 sps:$4 sm:$0xff]  }
 0x141   :  { %2337 = vmatmul.mubr.bf16.vlgmr.msra.gmra.mrb[0].mxu0 %v6886_v20  ;;  %2501 = vmatmul.mubr.bf16.vlgmr.msra.gmra.mrb[0].mxu1 %v6886_v20 }
 0x142   :  { %2346 = vmatpush1.bf16.msra.mxu0 %v6043_v18  ;;  %2510 = vmatpush1.bf16.msra.mxu1 %v6046_v19  ;;  %v6127_v18 = vld [vmem:[#allocation5 + $0x9b0] ss:$20 sps:$4 sm:$0xff]   ;;  %v6130_v19 = vld [vmem:[#allocation5 + $0x9b8] ss:$20 sps:$4 sm:$0xff]  }
 0x143   :  { %2347 = vmatprep.subr.bf16.mxu0 %v6051_v22  ;;  %2511 = vmatprep.subr.bf16.mxu1 %v6054_v23  ;;  %v6135_v22 = vld [vmem:[#allocation5 + $0x9dc] ss:$20 sps:$4 sm:$0xff]   ;;  %v6138_v23 = vld [vmem:[#allocation5 + $0x9e4] ss:$20 sps:$4 sm:$0xff]  }
 0x144   :  { %2377 = vmatprep.mubr.bf16.mxu0 %v6892_v25  ;;  %2541 = vmatprep.mubr.bf16.mxu1 %v6892_v25 }
 0x146   :  { %2348 = vmatpush1.bf16.msra.mxu0 %v6049_v24  ;;  %2512 = vmatpush1.bf16.msra.mxu1 %v6052_v26  ;;  %v6133_v24 = vld [vmem:[#allocation5 + $0x9d8] ss:$20 sps:$4 sm:$0xff]   ;;  %v6136_v26 = vld [vmem:[#allocation5 + $0x9e0] ss:$20 sps:$4 sm:$0xff]  }
 0x147   :  { %2349 = vmatprep.subr.bf16.mxu0 %v6057_v13  ;;  %2513 = vmatprep.subr.bf16.mxu1 %v6060_v27  ;;  %v6141_v13 = vld [vmem:[#allocation5 + $0x150] ss:$20 sps:$4 sm:$0xff]  }
 0x148   :  { %v6143_v27 = vld [vmem:[#allocation5 + $0x3d0] ss:$20 sps:$4 sm:$0xff]  }
 0x14a   :  { %2350 = vmatpush1.bf16.msra.mxu0 %v6055_v28  ;;  %2514 = vmatpush1.bf16.msra.mxu1 %v6058_v29  ;;  %v6900_v28 = vcombine.low %v6888_v21, %v6888_v21  ;;  %v6142_v29 = vld [vmem:[#allocation5 + $0x10] ss:$20 sps:$4 sm:$0xff]   ;;  %v6151_v21 = vld [vmem:[#allocation5 + $0x420] ss:$20 sps:$4 sm:$0xff]  }
 0x14b   :  { %2351 = vmatprep.subr.bf16.mxu0 %v6063_v31  ;;  %2515 = vmatprep.subr.bf16.mxu1 %v6066_v32  ;;  %v6144_v31 = vld [vmem:[#allocation5 + $0x290] ss:$20 sps:$4 sm:$0xff]   ;;  %v6145_v32 = vld [vmem:[#allocation5 + $0x178] ss:$20 sps:$4 sm:$0xff]  }
 0x14e   :  { %2352 = vmatpush1.bf16.msra.mxu0 %v6061_v33  ;;  %2516 = vmatpush1.bf16.msra.mxu1 %v6064_v34  ;;  %v6147_v33 = vld [vmem:[#allocation5 + $0x3f8] ss:$20 sps:$4 sm:$0xff]  }
 0x14f   :  { %2353 = vmatprep.subr.bf16.mxu0 %v6069_v35  ;;  %2517 = vmatprep.subr.bf16.mxu1 %v6072_v36  ;;  %v6146_v34 = vld [vmem:[#allocation5 + $0x38] ss:$20 sps:$4 sm:$0xff]   ;;  %v6149_v36 = vld [vmem:[#allocation5 + $0x1a0] ss:$20 sps:$4 sm:$0xff]  }
 0x150   :  { %v6148_v35 = vld [vmem:[#allocation5 + $0x2b8] ss:$20 sps:$4 sm:$0xff]  }
 0x152   :  { %2354 = vmatpush1.bf16.msra.mxu0 %v6067_v37  ;;  %2518 = vmatpush1.bf16.msra.mxu1 %v6070_v38  ;;  %v6150_v37 = vld [vmem:[#allocation5 + $0x60] ss:$20 sps:$4 sm:$0xff]  }
 0x153   :  { %2355 = vmatprep.subr.bf16.mxu0 %v6075_v39  ;;  %2519 = vmatprep.subr.bf16.mxu1 %v6078_v40  ;;  %v6152_v38 = vld [vmem:[#allocation5 + $0x2e0] ss:$20 sps:$4 sm:$0xff]   ;;  %v6153_v39 = vld [vmem:[#allocation5 + $0x1c8] ss:$20 sps:$4 sm:$0xff]  }
 0x154   :  { %v6155_v40 = vld [vmem:[#allocation5 + $0x448] ss:$20 sps:$4 sm:$0xff]  }
 0x156   :  { %2356 = vmatpush1.bf16.msra.mxu0 %v6073_v41  ;;  %2520 = vmatpush1.bf16.msra.mxu1 %v6076_v42  ;;  %v6154_v41 = vld [vmem:[#allocation5 + $0x88] ss:$20 sps:$4 sm:$0xff]  }
 0x157   :  { %2357 = vmatprep.subr.bf16.mxu0 %v6081_v43  ;;  %2521 = vmatprep.subr.bf16.mxu1 %v6084_v44  ;;  %v6156_v42 = vld [vmem:[#allocation5 + $0x308] ss:$20 sps:$4 sm:$0xff]   ;;  %v6157_v43 = vld [vmem:[#allocation5 + $0x1f0] ss:$20 sps:$4 sm:$0xff]  }
 0x158   :  { %v6159_v44 = vld [vmem:[#allocation5 + $0x470] ss:$20 sps:$4 sm:$0xff]  }
 0x15a   :  { %2358 = vmatpush1.bf16.msra.mxu0 %v6079_v45  ;;  %2522 = vmatpush1.bf16.msra.mxu1 %v6082_v46  ;;  %v6158_v45 = vld [vmem:[#allocation5 + $0xb0] ss:$20 sps:$4 sm:$0xff]   ;;  %v6163_v46 = vld [vmem:[#allocation5 + $0x498] ss:$20 sps:$4 sm:$0xff]  }
 0x15b   :  { %2359 = vmatprep.subr.bf16.mxu0 %v6087_v47  ;;  %2523 = vmatprep.subr.bf16.mxu1 %v6090_v49  ;;  %v6162_v47 = vld [vmem:[#allocation5 + $0xd8] ss:$20 sps:$4 sm:$0xff]  }
 0x15c   :  { %v6164_v49 = vld [vmem:[#allocation5 + $0x358] ss:$20 sps:$4 sm:$0xff]  }
 0x15e   :  { %2360 = vmatpush1.bf16.msra.mxu0 %v6085_v50  ;;  %2524 = vmatpush1.bf16.msra.mxu1 %v6088_v51  ;;  %v6165_v50 = vld [vmem:[#allocation5 + $0x240] ss:$20 sps:$4 sm:$0xff]  }
 0x15f   :  { %2361 = vmatprep.subr.bf16.mxu0 %v6093_v52  ;;  %2525 = vmatprep.subr.bf16.mxu1 %v6096_v53  ;;  %v6167_v51 = vld [vmem:[#allocation5 + $0x4c0] ss:$20 sps:$4 sm:$0xff]  }
 0x160   :  { %v6166_v52 = vld [vmem:[#allocation5 + $0x100] ss:$20 sps:$4 sm:$0xff]  }
 0x161   :  { %v6168_v53 = vld [vmem:[#allocation5 + $0x380] ss:$20 sps:$4 sm:$0xff]  }
 0x162   :  { %2362 = vmatpush1.bf16.msra.mxu0 %v6091_v54  ;;  %2526 = vmatpush1.bf16.msra.mxu1 %v6094_v55  ;;  %v6169_v54 = vld [vmem:[#allocation5 + $0x268] ss:$20 sps:$4 sm:$0xff]  }
 0x163   :  { %2363 = vmatprep.subr.bf16.mxu0 %v6099_v56  ;;  %2527 = vmatprep.subr.bf16.mxu1 %v6102_v57  ;;  %v6171_v55 = vld [vmem:[#allocation5 + $0x4e8] ss:$20 sps:$4 sm:$0xff]  }
 0x164   :  { %v6170_v56 = vld [vmem:[#allocation5 + $0x128] ss:$20 sps:$4 sm:$0xff]  }
 0x165   :  { %v6172_v57 = vld [vmem:[#allocation5 + $0x3a8] ss:$20 sps:$4 sm:$0xff]  }
 0x166   :  { %2364 = vmatpush1.bf16.msra.mxu0 %v6097_v58  ;;  %2528 = vmatpush1.bf16.msra.mxu1 %v6100_v59  ;;  %v6173_v58 = vld [vmem:[#allocation5 + $0x650] ss:$20 sps:$4 sm:$0xff]  }
 0x167   :  { %2365 = vmatprep.subr.bf16.mxu0 %v6105_v60  ;;  %2529 = vmatprep.subr.bf16.mxu1 %v6108_v61  ;;  %v6175_v59 = vld [vmem:[#allocation5 + $0x8d0] ss:$20 sps:$4 sm:$0xff]  }
 0x168   :  { %v6174_v60 = vld [vmem:[#allocation5 + $0x510] ss:$20 sps:$4 sm:$0xff]  }
 0x169   :  { %v6176_v61 = vld [vmem:[#allocation5 + $0x790] ss:$20 sps:$4 sm:$0xff]  }
 0x16a   :  { %2366 = vmatpush1.bf16.msra.mxu0 %v6103_v62  ;;  %2530 = vmatpush1.bf16.msra.mxu1 %v6106_v63  ;;  %v6177_v62 = vld [vmem:[#allocation5 + $0x678] ss:$20 sps:$4 sm:$0xff]  }
 0x16b   :  { %2367 = vmatprep.subr.bf16.mxu0 %v6111_v0  ;;  %2531 = vmatprep.subr.bf16.mxu1 %v6114_v1  ;;  %v6179_v63 = vld [vmem:[#allocation5 + $0x8f8] ss:$20 sps:$4 sm:$0xff]  }
 0x16c   :  { %v6178_v0 = vld [vmem:[#allocation5 + $0x538] ss:$20 sps:$4 sm:$0xff]  }
 0x16d   :  { %v6180_v1 = vld [vmem:[#allocation5 + $0x7b8] ss:$20 sps:$4 sm:$0xff]  }
 0x16e   :  { %2368 = vmatpush1.bf16.msra.mxu0 %v6109_v2  ;;  %2532 = vmatpush1.bf16.msra.mxu1 %v6112_v3  ;;  %v6181_v2 = vld [vmem:[#allocation5 + $0x6a0] ss:$20 sps:$4 sm:$0xff]  }
 0x16f   :  { %2369 = vmatprep.subr.bf16.mxu0 %v6117_v4  ;;  %2533 = vmatprep.subr.bf16.mxu1 %v6120_v6  ;;  %v6183_v3 = vld [vmem:[#allocation5 + $0x920] ss:$20 sps:$4 sm:$0xff]  }
 0x170   :  { %v6182_v4 = vld [vmem:[#allocation5 + $0x560] ss:$20 sps:$4 sm:$0xff]  }
 0x171   :  { %v6184_v6 = vld [vmem:[#allocation5 + $0x7e0] ss:$20 sps:$4 sm:$0xff]  }
 0x172   :  { %2370 = vmatpush1.bf16.msra.mxu0 %v6115_v7  ;;  %2534 = vmatpush1.bf16.msra.mxu1 %v6118_v8  ;;  %v6185_v7 = vld [vmem:[#allocation5 + $0x6c8] ss:$20 sps:$4 sm:$0xff]  }
 0x173   :  { %2371 = vmatprep.subr.bf16.mxu0 %v6123_v10  ;;  %2535 = vmatprep.subr.bf16.mxu1 %v6126_v11  ;;  %v6187_v8 = vld [vmem:[#allocation5 + $0x948] ss:$20 sps:$4 sm:$0xff]   ;;  %v6189_v10 = vld [vmem:[#allocation5 + $0x6f0] ss:$20 sps:$4 sm:$0xff]  }
 0x174   :  { %v6191_v11 = vld [vmem:[#allocation5 + $0x970] ss:$20 sps:$4 sm:$0xff]  }
 0x176   :  { %2372 = vmatpush1.bf16.msra.mxu0 %v6121_v12  ;;  %2536 = vmatpush1.bf16.msra.mxu1 %v6124_v14  ;;  %v6190_v12 = vld [vmem:[#allocation5 + $0x5b0] ss:$20 sps:$4 sm:$0xff]  }
 0x177   :  { %2373 = vmatprep.subr.bf16.mxu0 %v6129_v16  ;;  %2537 = vmatprep.subr.bf16.mxu1 %v6132_v17  ;;  %v6192_v14 = vld [vmem:[#allocation5 + $0x830] ss:$20 sps:$4 sm:$0xff]   ;;  %v6193_v16 = vld [vmem:[#allocation5 + $0x718] ss:$20 sps:$4 sm:$0xff]  }
 0x178   :  { %v6196_v17 = vld [vmem:[#allocation5 + $0x858] ss:$20 sps:$4 sm:$0xff]  }
 0x17a   :  { %2374 = vmatpush1.bf16.msra.mxu0 %v6127_v18  ;;  %2538 = vmatpush1.bf16.msra.mxu1 %v6130_v19  ;;  %v6197_v18 = vld [vmem:[#allocation5 + $0x740] ss:$20 sps:$4 sm:$0xff]  }
 0x17b   :  { %2375 = vmatprep.subr.bf16.mxu0 %v6135_v22  ;;  %2539 = vmatprep.subr.bf16.mxu1 %v6138_v23  ;;  %v6199_v19 = vld [vmem:[#allocation5 + $0x9c0] ss:$20 sps:$4 sm:$0xff]  }
 0x17c   :  { %v6198_v22 = vld [vmem:[#allocation5 + $0x600] ss:$20 sps:$4 sm:$0xff]  }
 0x17d   :  { %v6200_v23 = vld [vmem:[#allocation5 + $0x880] ss:$20 sps:$4 sm:$0xff]  }
 0x17e   :  { %2376 = vmatpush1.bf16.msra.mxu0 %v6133_v24  ;;  %2540 = vmatpush1.bf16.msra.mxu1 %v6136_v26  ;;  %v6201_v24 = vld [vmem:[#allocation5 + $0x768] ss:$20 sps:$4 sm:$0xff]  }
 0x17f   :  { %5452 = vmatprep.subr.bf16.mxu0 %v6141_v13  ;;  %5474 = vmatprep.subr.bf16.mxu1 %v6143_v27  ;;  %v6203_v26 = vld [vmem:[#allocation5 + $0x9e8] ss:$20 sps:$4 sm:$0xff]  }
 0x180   :  { %v6202_v13 = vld [vmem:[#allocation5 + $0x628] ss:$20 sps:$4 sm:$0xff]  }
 0x181   :  { %2378 = vmatmul.mubr.bf16.vlgmr.msra.gmra.mrb[0].mxu0 %v6900_v28  ;;  %2542 = vmatmul.mubr.bf16.vlgmr.msra.gmra.mrb[0].mxu1 %v6900_v28  ;;  %v6204_v27 = vld [vmem:[#allocation5 + $0x8a8] ss:$20 sps:$4 sm:$0xff]  }
 0x182   :  { %5453 = vmatpush3.bf16.msra.mxu0 %v6142_v29  ;;  %5475 = vmatpush3.bf16.msra.mxu1 %v6144_v31  ;;  %v6207_v29 = vld [vmem:[#allocation8 + $0x4] ss:$20 sps:$4 sm:$0xff]   ;;  %v6210_v31 = vld [vmem:[#allocation8 + $0xc] ss:$20 sps:$4 sm:$0xff]  }
 0x183   :  { %5454 = vmatprep.subr.bf16.mxu0 %v6145_v32  ;;  %5476 = vmatprep.subr.bf16.mxu1 %v6147_v33  ;;  %v6205_v32 = vld [vmem:[#allocation8] ss:$20 sps:$4 sm:$0xff]   ;;  %v6208_v33 = vld [vmem:[#allocation8 + $0x8] ss:$20 sps:$4 sm:$0xff]  }
 0x184   :  { %2582 = vmatprep.mubr.bf16.mxu0 %v6854_v48  ;;  %2622 = vmatprep.mubr.bf16.mxu1 %v6866_v30  ;;  %v6160_v48 = vld [vmem:[#allocation5 + $0x330] ss:$20 sps:$4 sm:$0xff]   ;;  %v6161_v30 = vld [vmem:[#allocation5 + $0x218] ss:$20 sps:$4 sm:$0xff]  }
 0x186   :  { %5455 = vmatpush3.bf16.msra.mxu0 %v6146_v34  ;;  %5477 = vmatpush3.bf16.msra.mxu1 %v6148_v35  ;;  %v6213_v34 = vld [vmem:[#allocation8 + $0x2c] ss:$20 sps:$4 sm:$0xff]   ;;  %v6216_v35 = vld [vmem:[#allocation8 + $0x34] ss:$20 sps:$4 sm:$0xff]  }
 0x187   :  { %5456 = vmatprep.subr.bf16.mxu0 %v6149_v36  ;;  %5478 = vmatprep.subr.bf16.mxu1 %v6151_v21  ;;  %v6211_v36 = vld [vmem:[#allocation8 + $0x28] ss:$20 sps:$4 sm:$0xff]   ;;  %v6214_v21 = vld [vmem:[#allocation8 + $0x30] ss:$20 sps:$4 sm:$0xff]  }
 0x18a   :  { %5457 = vmatpush3.bf16.msra.mxu0 %v6150_v37  ;;  %5479 = vmatpush3.bf16.msra.mxu1 %v6152_v38  ;;  %v6219_v37 = vld [vmem:[#allocation8 + $0x54] ss:$20 sps:$4 sm:$0xff]   ;;  %v6222_v38 = vld [vmem:[#allocation8 + $0x5c] ss:$20 sps:$4 sm:$0xff]  }
 0x18b   :  { %5458 = vmatprep.subr.bf16.mxu0 %v6153_v39  ;;  %5480 = vmatprep.subr.bf16.mxu1 %v6155_v40  ;;  %v6217_v39 = vld [vmem:[#allocation8 + $0x50] ss:$20 sps:$4 sm:$0xff]   ;;  %v6220_v40 = vld [vmem:[#allocation8 + $0x58] ss:$20 sps:$4 sm:$0xff]  }
 0x18e   :  { %5459 = vmatpush3.bf16.msra.mxu0 %v6154_v41  ;;  %5481 = vmatpush3.bf16.msra.mxu1 %v6156_v42  ;;  %v6225_v41 = vld [vmem:[#allocation8 + $0x7c] ss:$20 sps:$4 sm:$0xff]   ;;  %v6228_v42 = vld [vmem:[#allocation8 + $0x84] ss:$20 sps:$4 sm:$0xff]  }
 0x18f   :  { %5460 = vmatprep.subr.bf16.mxu0 %v6157_v43  ;;  %5482 = vmatprep.subr.bf16.mxu1 %v6159_v44  ;;  %v6223_v43 = vld [vmem:[#allocation8 + $0x78] ss:$20 sps:$4 sm:$0xff]   ;;  %v6226_v44 = vld [vmem:[#allocation8 + $0x80] ss:$20 sps:$4 sm:$0xff]  }
 0x192   :  { %5461 = vmatpush3.bf16.msra.mxu0 %v6158_v45  ;;  %5483 = vmatpush3.bf16.msra.mxu1 %v6160_v48  ;;  %v6231_v45 = vld [vmem:[#allocation8 + $0xa4] ss:$20 sps:$4 sm:$0xff]   ;;  %v6232_v48 = vld [vmem:[#allocation8 + $0xa8] ss:$20 sps:$4 sm:$0xff]  }
 0x193   :  { %5462 = vmatprep.subr.bf16.mxu0 %v6161_v30  ;;  %5484 = vmatprep.subr.bf16.mxu1 %v6163_v46  ;;  %v6237_v30 = vld [vmem:[#allocation8 + $0xcc] ss:$20 sps:$4 sm:$0xff]   ;;  %v6240_v46 = vld [vmem:[#allocation8 + $0xd4] ss:$20 sps:$4 sm:$0xff]  }
 0x196   :  { %5463 = vmatpush3.bf16.msra.mxu0 %v6162_v47  ;;  %5485 = vmatpush3.bf16.msra.mxu1 %v6164_v49  ;;  %v6235_v47 = vld [vmem:[#allocation8 + $0xc8] ss:$20 sps:$4 sm:$0xff]   ;;  %v6238_v49 = vld [vmem:[#allocation8 + $0xd0] ss:$20 sps:$4 sm:$0xff]  }
 0x197   :  { %5464 = vmatprep.subr.bf16.mxu0 %v6165_v50  ;;  %5486 = vmatprep.subr.bf16.mxu1 %v6167_v51  ;;  %v6243_v50 = vld [vmem:[#allocation8 + $0xf4] ss:$20 sps:$4 sm:$0xff]   ;;  %v6246_v51 = vld [vmem:[#allocation8 + $0xfc] ss:$20 sps:$4 sm:$0xff]  }
 0x19a   :  { %5465 = vmatpush3.bf16.msra.mxu0 %v6166_v52  ;;  %5487 = vmatpush3.bf16.msra.mxu1 %v6168_v53  ;;  %v6241_v52 = vld [vmem:[#allocation8 + $0xf0] ss:$20 sps:$4 sm:$0xff]   ;;  %v6244_v53 = vld [vmem:[#allocation8 + $0xf8] ss:$20 sps:$4 sm:$0xff]  }
 0x19b   :  { %5466 = vmatprep.subr.bf16.mxu0 %v6169_v54  ;;  %5488 = vmatprep.subr.bf16.mxu1 %v6171_v55  ;;  %v6249_v54 = vld [vmem:[#allocation8 + $0x11c] ss:$20 sps:$4 sm:$0xff]   ;;  %v6252_v55 = vld [vmem:[#allocation8 + $0x124] ss:$20 sps:$4 sm:$0xff]  }
 0x19e   :  { %5467 = vmatpush3.bf16.msra.mxu0 %v6170_v56  ;;  %5489 = vmatpush3.bf16.msra.mxu1 %v6172_v57  ;;  %v6247_v56 = vld [vmem:[#allocation8 + $0x118] ss:$20 sps:$4 sm:$0xff]   ;;  %v6250_v57 = vld [vmem:[#allocation8 + $0x120] ss:$20 sps:$4 sm:$0xff]  }
 0x19f   :  { %5496 = vmatprep.subr.bf16.mxu0 %v6173_v58  ;;  %5518 = vmatprep.subr.bf16.mxu1 %v6175_v59  ;;  %v6255_v58 = vld [vmem:[#allocation8 + $0x144] ss:$20 sps:$4 sm:$0xff]   ;;  %v6258_v59 = vld [vmem:[#allocation8 + $0x14c] ss:$20 sps:$4 sm:$0xff]  }
 0x1a1   :  { %2583 = vmatmul.mubr.bf16.vlgmr.msra.gmra.mrb[4].mxu0 %v6858_v5  ;;  %2623 = vmatmul.mubr.bf16.vlgmr.msra.gmra.mrb[4].mxu1 %v6872_v9  ;;  %v6186_v5 = vld [vmem:[#allocation5 + $0x588] ss:$20 sps:$4 sm:$0xff]  }
 0x1a2   :  { %5497 = vmatpush3.bf16.msra.mxu0 %v6174_v60  ;;  %5519 = vmatpush3.bf16.msra.mxu1 %v6176_v61  ;;  %v6188_v9 = vld [vmem:[#allocation5 + $0x808] ss:$20 sps:$4 sm:$0xff]   ;;  %v6256_v61 = vld [vmem:[#allocation8 + $0x148] ss:$20 sps:$4 sm:$0xff]  }
 0x1a3   :  { %5498 = vmatprep.subr.bf16.mxu0 %v6177_v62  ;;  %5520 = vmatprep.subr.bf16.mxu1 %v6179_v63  ;;  %v6253_v60 = vld [vmem:[#allocation8 + $0x140] ss:$20 sps:$4 sm:$0xff]  }
 0x1a4   :  { %2662 = vmatprep.mubr.bf16.mxu0 %v6878_v15  ;;  %2702 = vmatprep.mubr.bf16.mxu1 %v6892_v25  ;;  %v6195_v15 = vld [vmem:[#allocation5 + $0x998] ss:$20 sps:$4 sm:$0xff]   ;;  %v6261_v62 = vld [vmem:[#allocation8 + $0x16c] ss:$20 sps:$4 sm:$0xff]  }
 0x1a5   :  { %v6194_v25 = vld [vmem:[#allocation5 + $0x5d8] ss:$20 sps:$4 sm:$0xff]  }
 0x1a6   :  { %5499 = vmatpush3.bf16.msra.mxu0 %v6178_v0  ;;  %5521 = vmatpush3.bf16.msra.mxu1 %v6180_v1  ;;  %v6264_v63 = vld [vmem:[#allocation8 + $0x174] ss:$20 sps:$4 sm:$0xff]   ;;  %v6262_v1 = vld [vmem:[#allocation8 + $0x170] ss:$20 sps:$4 sm:$0xff]  }
 0x1a7   :  { %5500 = vmatprep.subr.bf16.mxu0 %v6181_v2  ;;  %5522 = vmatprep.subr.bf16.mxu1 %v6183_v3  ;;  %v6259_v0 = vld [vmem:[#allocation8 + $0x168] ss:$20 sps:$4 sm:$0xff]  }
 0x1a8   :  { %v6267_v2 = vld [vmem:[#allocation8 + $0x194] ss:$20 sps:$4 sm:$0xff]   ;;  %v6270_v3 = vld [vmem:[#allocation8 + $0x19c] ss:$20 sps:$4 sm:$0xff]  }
 0x1aa   :  { %5501 = vmatpush3.bf16.msra.mxu0 %v6182_v4  ;;  %5523 = vmatpush3.bf16.msra.mxu1 %v6184_v6  ;;  %v6265_v4 = vld [vmem:[#allocation8 + $0x190] ss:$20 sps:$4 sm:$0xff]   ;;  %v6268_v6 = vld [vmem:[#allocation8 + $0x198] ss:$20 sps:$4 sm:$0xff]  }
 0x1ab   :  { %5502 = vmatprep.subr.bf16.mxu0 %v6185_v7  ;;  %5524 = vmatprep.subr.bf16.mxu1 %v6187_v8  ;;  %v6273_v7 = vld [vmem:[#allocation8 + $0x1bc] ss:$20 sps:$4 sm:$0xff]   ;;  %v6276_v8 = vld [vmem:[#allocation8 + $0x1c4] ss:$20 sps:$4 sm:$0xff]  }
 0x1ae   :  { %5503 = vmatpush3.bf16.msra.mxu0 %v6186_v5  ;;  %5525 = vmatpush3.bf16.msra.mxu1 %v6188_v9  ;;  %v6271_v5 = vld [vmem:[#allocation8 + $0x1b8] ss:$20 sps:$4 sm:$0xff]   ;;  %v6274_v9 = vld [vmem:[#allocation8 + $0x1c0] ss:$20 sps:$4 sm:$0xff]  }
 0x1af   :  { %5504 = vmatprep.subr.bf16.mxu0 %v6189_v10  ;;  %5526 = vmatprep.subr.bf16.mxu1 %v6191_v11  ;;  %v6279_v10 = vld [vmem:[#allocation8 + $0x1e4] ss:$20 sps:$4 sm:$0xff]   ;;  %v6282_v11 = vld [vmem:[#allocation8 + $0x1ec] ss:$20 sps:$4 sm:$0xff]  }
 0x1b2   :  { %5505 = vmatpush3.bf16.msra.mxu0 %v6190_v12  ;;  %5527 = vmatpush3.bf16.msra.mxu1 %v6192_v14  ;;  %v6277_v12 = vld [vmem:[#allocation8 + $0x1e0] ss:$20 sps:$4 sm:$0xff]   ;;  %v6280_v14 = vld [vmem:[#allocation8 + $0x1e8] ss:$20 sps:$4 sm:$0xff]  }
 0x1b3   :  { %5506 = vmatprep.subr.bf16.mxu0 %v6193_v16  ;;  %5528 = vmatprep.subr.bf16.mxu1 %v6195_v15  ;;  %v6285_v16 = vld [vmem:[#allocation8 + $0x20c] ss:$20 sps:$4 sm:$0xff]   ;;  %v6288_v15 = vld [vmem:[#allocation8 + $0x214] ss:$20 sps:$4 sm:$0xff]  }
 0x1b6   :  { %5507 = vmatpush3.bf16.msra.mxu0 %v6194_v25  ;;  %5529 = vmatpush3.bf16.msra.mxu1 %v6196_v17  ;;  %v6283_v25 = vld [vmem:[#allocation8 + $0x208] ss:$20 sps:$4 sm:$0xff]   ;;  %v6286_v17 = vld [vmem:[#allocation8 + $0x210] ss:$20 sps:$4 sm:$0xff]  }
 0x1b7   :  { %5508 = vmatprep.subr.bf16.mxu0 %v6197_v18  ;;  %5530 = vmatprep.subr.bf16.mxu1 %v6199_v19  ;;  %v6291_v18 = vld [vmem:[#allocation8 + $0x234] ss:$20 sps:$4 sm:$0xff]   ;;  %v6294_v19 = vld [vmem:[#allocation8 + $0x23c] ss:$20 sps:$4 sm:$0xff]  }
 0x1ba   :  { %5509 = vmatpush3.bf16.msra.mxu0 %v6198_v22  ;;  %5531 = vmatpush3.bf16.msra.mxu1 %v6200_v23  ;;  %v6289_v22 = vld [vmem:[#allocation8 + $0x230] ss:$20 sps:$4 sm:$0xff]   ;;  %v6292_v23 = vld [vmem:[#allocation8 + $0x238] ss:$20 sps:$4 sm:$0xff]  }
 0x1bb   :  { %5510 = vmatprep.subr.bf16.mxu0 %v6201_v24  ;;  %5532 = vmatprep.subr.bf16.mxu1 %v6203_v26  ;;  %v6297_v24 = vld [vmem:[#allocation8 + $0x25c] ss:$20 sps:$4 sm:$0xff]   ;;  %v6300_v26 = vld [vmem:[#allocation8 + $0x264] ss:$20 sps:$4 sm:$0xff]  }
 0x1be   :  { %5511 = vmatpush3.bf16.msra.mxu0 %v6202_v13  ;;  %5533 = vmatpush3.bf16.msra.mxu1 %v6204_v27  ;;  %v6295_v13 = vld [vmem:[#allocation8 + $0x258] ss:$20 sps:$4 sm:$0xff]   ;;  %v6298_v27 = vld [vmem:[#allocation8 + $0x260] ss:$20 sps:$4 sm:$0xff]  }
 0x1bf   :  { %4027 = vmatprep.subr.bf16.mxu0 %v6207_v29  ;;  %4150 = vmatprep.subr.bf16.mxu1 %v6210_v31  ;;  %v6303_v29 = vld [vmem:[#allocation8 + $0x284] ss:$20 sps:$4 sm:$0xff]   ;;  %v6306_v31 = vld [vmem:[#allocation8 + $0x28c] ss:$20 sps:$4 sm:$0xff]  }
 0x1c1   :  { %2663 = vmatmul.mubr.bf16.vlgmr.msra.gmra.mrb[8].mxu0 %v6886_v20  ;;  %2703 = vmatmul.mubr.bf16.vlgmr.msra.gmra.mrb[8].mxu1 %v6900_v28  ;;  %v6234_v20 = vld [vmem:[#allocation8 + $0xac] ss:$20 sps:$4 sm:$0xff]  }
 0x1c2   :  { %4028 = vmatpush1.bf16.msra.mxu0 %v6205_v32  ;;  %4151 = vmatpush1.bf16.msra.mxu1 %v6208_v33  ;;  %v6229_v28 = vld [vmem:[#allocation8 + $0xa0] ss:$20 sps:$4 sm:$0xff]   ;;  %v505_v32 = vlaneseq }
 0x1c3   :  { %4029 = vmatprep.subr.bf16.mxu0 %v6213_v34  ;;  %4152 = vmatprep.subr.bf16.mxu1 %v6216_v35  ;;  %v6916_v35 = vld [vmem:[#allocation7] sm:$0x1f] }
 0x1c4   :  { %v6913_v33 = vshrl.u32 %v505_v32, 7 }
 0x1c6   :  { %4030 = vmatpush1.bf16.msra.mxu0 %v6211_v36  ;;  %4153 = vmatpush1.bf16.msra.mxu1 %v6214_v21  ;;  %v507_v34 = vsub.s32 0, %v6913_v33  ;;  %v511_v36 = vsub.s32 1, %v6913_v33  ;;  %v519_v21 = vsub.s32 3, %v6913_v33 }
 0x1c7   :  { %4031 = vmatprep.subr.bf16.mxu0 %v6219_v37  ;;  %4154 = vmatprep.subr.bf16.mxu1 %v6222_v38 }
 0x1c8   :  { %v508_v37 = vrot.slane %v6916_v35, %v507_v34  ;;  %v512_v38 = vrot.slane %v6916_v35, %v511_v36 }
 0x1ca   :  { %4032 = vmatpush1.bf16.msra.mxu0 %v6217_v39  ;;  %4155 = vmatpush1.bf16.msra.mxu1 %v6220_v40  ;;  %v520_v39 = vrot.slane %v6916_v35, %v519_v21 }
 0x1cb   :  { %4033 = vmatprep.subr.bf16.mxu0 %v6225_v41  ;;  %4156 = vmatprep.subr.bf16.mxu1 %v6228_v42 }
 0x1ce   :  { %4034 = vmatpush1.bf16.msra.mxu0 %v6223_v43  ;;  %4157 = vmatpush1.bf16.msra.mxu1 %v6226_v44 }
 0x1cf   :  { %4035 = vmatprep.subr.bf16.mxu0 %v6231_v45  ;;  %4158 = vmatprep.subr.bf16.mxu1 %v6234_v20 }
 0x1d2   :  { %4036 = vmatpush1.bf16.msra.mxu0 %v6229_v28  ;;  %4159 = vmatpush1.bf16.msra.mxu1 %v6232_v48 }
 0x1d3   :  { %4037 = vmatprep.subr.bf16.mxu0 %v6237_v30  ;;  %4160 = vmatprep.subr.bf16.mxu1 %v6240_v46 }
 0x1d6   :  { %4038 = vmatpush1.bf16.msra.mxu0 %v6235_v47  ;;  %4161 = vmatpush1.bf16.msra.mxu1 %v6238_v49 }
 0x1d7   :  { %4039 = vmatprep.subr.bf16.mxu0 %v6243_v50  ;;  %4162 = vmatprep.subr.bf16.mxu1 %v6246_v51 }
 0x1da   :  { %4040 = vmatpush1.bf16.msra.mxu0 %v6241_v52  ;;  %4163 = vmatpush1.bf16.msra.mxu1 %v6244_v53  ;;  %v6301_v52 = vld [vmem:[#allocation8 + $0x280] ss:$20 sps:$4 sm:$0xff]   ;;  %v6304_v53 = vld [vmem:[#allocation8 + $0x288] ss:$20 sps:$4 sm:$0xff]  }
 0x1db   :  { %4041 = vmatprep.subr.bf16.mxu0 %v6249_v54  ;;  %4164 = vmatprep.subr.bf16.mxu1 %v6252_v55  ;;  %v6309_v55 = vld [vmem:[#allocation8 + $0x2ac] ss:$20 sps:$4 sm:$0xff]  }
 0x1de   :  { %4042 = vmatpush1.bf16.msra.mxu0 %v6247_v56  ;;  %4165 = vmatpush1.bf16.msra.mxu1 %v6250_v57  ;;  %v6312_v56 = vld [vmem:[#allocation8 + $0x2b4] ss:$20 sps:$4 sm:$0xff]  }
 0x1df   :  { %4043 = vmatprep.subr.bf16.mxu0 %v6255_v58  ;;  %4166 = vmatprep.subr.bf16.mxu1 %v6258_v59  ;;  %v6307_v58 = vld [vmem:[#allocation8 + $0x2a8] ss:$20 sps:$4 sm:$0xff]   ;;  %v6310_v59 = vld [vmem:[#allocation8 + $0x2b0] ss:$20 sps:$4 sm:$0xff]  }
 0x1e2   :  { %4044 = vmatpush1.bf16.msra.mxu0 %v6253_v60  ;;  %4167 = vmatpush1.bf16.msra.mxu1 %v6256_v61  ;;  %v6315_v60 = vld [vmem:[#allocation8 + $0x2d4] ss:$20 sps:$4 sm:$0xff]   ;;  %v6318_v61 = vld [vmem:[#allocation8 + $0x2dc] ss:$20 sps:$4 sm:$0xff]  }
 0x1e3   :  { %4045 = vmatprep.subr.bf16.mxu0 %v6261_v62  ;;  %4168 = vmatprep.subr.bf16.mxu1 %v6264_v63  ;;  %v6313_v62 = vld [vmem:[#allocation8 + $0x2d0] ss:$20 sps:$4 sm:$0xff]   ;;  %v6316_v63 = vld [vmem:[#allocation8 + $0x2d8] ss:$20 sps:$4 sm:$0xff]  }
 0x1e6   :  { %4046 = vmatpush1.bf16.msra.mxu0 %v6259_v0  ;;  %4169 = vmatpush1.bf16.msra.mxu1 %v6262_v1  ;;  %v6321_v0 = vld [vmem:[#allocation8 + $0x2fc] ss:$20 sps:$4 sm:$0xff]   ;;  %v6324_v1 = vld [vmem:[#allocation8 + $0x304] ss:$20 sps:$4 sm:$0xff]  }
 0x1e7   :  { %4047 = vmatprep.subr.bf16.mxu0 %v6267_v2  ;;  %4170 = vmatprep.subr.bf16.mxu1 %v6270_v3  ;;  %v6319_v2 = vld [vmem:[#allocation8 + $0x2f8] ss:$20 sps:$4 sm:$0xff]   ;;  %v6322_v3 = vld [vmem:[#allocation8 + $0x300] ss:$20 sps:$4 sm:$0xff]  }
 0x1ea   :  { %4048 = vmatpush1.bf16.msra.mxu0 %v6265_v4  ;;  %4171 = vmatpush1.bf16.msra.mxu1 %v6268_v6  ;;  %v6327_v4 = vld [vmem:[#allocation8 + $0x324] ss:$20 sps:$4 sm:$0xff]   ;;  %v6330_v6 = vld [vmem:[#allocation8 + $0x32c] ss:$20 sps:$4 sm:$0xff]  }
 0x1eb   :  { %4049 = vmatprep.subr.bf16.mxu0 %v6273_v7  ;;  %4172 = vmatprep.subr.bf16.mxu1 %v6276_v8  ;;  %v6325_v7 = vld [vmem:[#allocation8 + $0x320] ss:$20 sps:$4 sm:$0xff]   ;;  %v6328_v8 = vld [vmem:[#allocation8 + $0x328] ss:$20 sps:$4 sm:$0xff]  }
 0x1ee   :  { %4050 = vmatpush1.bf16.msra.mxu0 %v6271_v5  ;;  %4173 = vmatpush1.bf16.msra.mxu1 %v6274_v9  ;;  %v6333_v5 = vld [vmem:[#allocation8 + $0x34c] ss:$20 sps:$4 sm:$0xff]   ;;  %v6336_v9 = vld [vmem:[#allocation8 + $0x354] ss:$20 sps:$4 sm:$0xff]  }
 0x1ef   :  { %4051 = vmatprep.subr.bf16.mxu0 %v6279_v10  ;;  %4174 = vmatprep.subr.bf16.mxu1 %v6282_v11  ;;  %v6331_v10 = vld [vmem:[#allocation8 + $0x348] ss:$20 sps:$4 sm:$0xff]   ;;  %v6334_v11 = vld [vmem:[#allocation8 + $0x350] ss:$20 sps:$4 sm:$0xff]  }
 0x1f2   :  { %4052 = vmatpush1.bf16.msra.mxu0 %v6277_v12  ;;  %4175 = vmatpush1.bf16.msra.mxu1 %v6280_v14  ;;  %v6339_v12 = vld [vmem:[#allocation8 + $0x374] ss:$20 sps:$4 sm:$0xff]   ;;  %v6342_v14 = vld [vmem:[#allocation8 + $0x37c] ss:$20 sps:$4 sm:$0xff]  }
 0x1f3   :  { %4053 = vmatprep.subr.bf16.mxu0 %v6285_v16  ;;  %4176 = vmatprep.subr.bf16.mxu1 %v6288_v15  ;;  %v523_v16 = vsub.s32 4, %v6913_v33  ;;  %v6337_v15 = vld [vmem:[#allocation8 + $0x370] ss:$20 sps:$4 sm:$0xff]  }
 0x1f6   :  { %4054 = vmatpush1.bf16.msra.mxu0 %v6283_v25  ;;  %4177 = vmatpush1.bf16.msra.mxu1 %v6286_v17  ;;  %v6340_v25 = vld [vmem:[#allocation8 + $0x378] ss:$20 sps:$4 sm:$0xff]   ;;  %v6345_v17 = vld [vmem:[#allocation8 + $0x39c] ss:$20 sps:$4 sm:$0xff]  }
 0x1f7   :  { %4055 = vmatprep.subr.bf16.mxu0 %v6291_v18  ;;  %4178 = vmatprep.subr.bf16.mxu1 %v6294_v19  ;;  %v6348_v18 = vld [vmem:[#allocation8 + $0x3a4] ss:$20 sps:$4 sm:$0xff]  }
 0x1fa   :  { %4056 = vmatpush1.bf16.msra.mxu0 %v6289_v22  ;;  %4179 = vmatpush1.bf16.msra.mxu1 %v6292_v23  ;;  %v524_v22 = vrot.slane %v6916_v35, %v523_v16 }
 0x1fb   :  { %4057 = vmatprep.subr.bf16.mxu0 %v6297_v24  ;;  %4180 = vmatprep.subr.bf16.mxu1 %v6300_v26 }
 0x1fe   :  { %4058 = vmatpush1.bf16.msra.mxu0 %v6295_v13  ;;  %4181 = vmatpush1.bf16.msra.mxu1 %v6298_v27  ;;  %v6343_v13 = vld [vmem:[#allocation8 + $0x398] ss:$20 sps:$4 sm:$0xff]   ;;  %v6346_v27 = vld [vmem:[#allocation8 + $0x3a0] ss:$20 sps:$4 sm:$0xff]  }
 0x1ff   :  { %4068 = vmatprep.subr.bf16.mxu0 %v6303_v29  ;;  %4191 = vmatprep.subr.bf16.mxu1 %v6306_v31 }
 0x254   :  { %v2379_v40 = vpop.f32.mrb[0].mxu0  ;;  %v6929_v41 = vpop.f32.mrb[0].mxu1 }
 0x255   :  { %v5686_v42 = vadd.f32 %v2379_v40, %v508_v37  ;;  %v2381_v43 = vpop.f32.mrb[1].mxu0  ;;  %v2545_v44 = vpop.f32.mrb[1].mxu1  ;;  %v6354_v40 = vld [vmem:[#allocation8 + $0x3cc] ss:$20 sps:$4 sm:$0xff]  }
 0x256   :  { %v5687_v45 = vadd.f32 %v2381_v43, %v512_v38  ;;  %v5689_v20 = vadd.f32 %v2545_v44, %v520_v39  ;;  %v2383_v28 = vpop.f32.mrb[2].mxu0  ;;  %v2547_v48 = vpop.f32.mrb[2].mxu1  ;;  %v6351_v39 = vld [vmem:[#allocation8 + $0x3c4] ss:$20 sps:$4 sm:$0xff]  }
 0x257   :  { %v2710_v30 = vmax.f32 %v5686_v42, 0.0  ;;  %v2384_v46 = vpop.f32.mrb[3].mxu0  ;;  %v2548_v47 = vpop.f32.mrb[3].mxu1  ;;  %v6357_v48 = vld [vmem:[#allocation8 + $0x3ec] ss:$20 sps:$4 sm:$0xff]  }
 0x258   :  { %v2711_v49 = vmax.f32 %v5687_v45, 0.0  ;;  %v2713_v50 = vmax.f32 %v5689_v20, 0.0  ;;  %v6349_v45 = vld [vmem:[#allocation8 + $0x3c0] ss:$20 sps:$4 sm:$0xff]   ;;  %v6352_v20 = vld [vmem:[#allocation8 + $0x3c8] ss:$20 sps:$4 sm:$0xff]  }
 0x259   :  { %v6933_v54 = vpack.c.bf16 %v2710_v30, %v2710_v30  ;;  %v6360_v30 = vld [vmem:[#allocation8 + $0x3f4] ss:$20 sps:$4 sm:$0xff]   ;;  %v6358_v47 = vld [vmem:[#allocation8 + $0x3f0] ss:$20 sps:$4 sm:$0xff]  }
 0x25a   :  { %v6931_v51 = vpack.c.bf16 %v2711_v49, %v2711_v49  ;;  %v6937_v57 = vpack.c.bf16 %v2713_v50, %v2713_v50  ;;  %v6355_v46 = vld [vmem:[#allocation8 + $0x3e8] ss:$20 sps:$4 sm:$0xff]  }
 0x25b   :  { %v6363_v49 = vld [vmem:[#allocation8 + $0x414] ss:$20 sps:$4 sm:$0xff]   ;;  %v6366_v50 = vld [vmem:[#allocation8 + $0x41c] ss:$20 sps:$4 sm:$0xff]  }
 0x25c   :  { %4059 = vmatprep.mubr.bf16.mxu0 %v6931_v51  ;;  %4182 = vmatprep.mubr.bf16.mxu1 %v6931_v51 }
 0x25d   :  { %4060 = vmatmul.mubr.bf16.vlgmr.msra.gmra.mrb[12].mxu0 %v6933_v54  ;;  %4183 = vmatmul.mubr.bf16.vlgmr.msra.gmra.mrb[12].mxu1 %v6933_v54 }
 0x25e   :  { %4069 = vmatpush1.bf16.msra.mxu0 %v6301_v52  ;;  %4192 = vmatpush1.bf16.msra.mxu1 %v6304_v53  ;;  %v6361_v52 = vld [vmem:[#allocation8 + $0x410] ss:$20 sps:$4 sm:$0xff]   ;;  %v6364_v53 = vld [vmem:[#allocation8 + $0x418] ss:$20 sps:$4 sm:$0xff]  }
 0x25f   :  { %4100 = vmatprep.mubr.bf16.mxu0 %v6937_v57  ;;  %4223 = vmatprep.mubr.bf16.mxu1 %v6937_v57 }
 0x260   :  { %4070 = vmatprep.subr.bf16.mxu0 %v6309_v55  ;;  %4193 = vmatprep.subr.bf16.mxu1 %v6312_v56  ;;  %v6369_v55 = vld [vmem:[#allocation8 + $0x43c] ss:$20 sps:$4 sm:$0xff]   ;;  %v6372_v56 = vld [vmem:[#allocation8 + $0x444] ss:$20 sps:$4 sm:$0xff]  }
 0x262   :  { %4071 = vmatpush1.bf16.msra.mxu0 %v6307_v58  ;;  %4194 = vmatpush1.bf16.msra.mxu1 %v6310_v59  ;;  %v6367_v58 = vld [vmem:[#allocation8 + $0x438] ss:$20 sps:$4 sm:$0xff]   ;;  %v6370_v59 = vld [vmem:[#allocation8 + $0x440] ss:$20 sps:$4 sm:$0xff]  }
 0x263   :  { %4072 = vmatprep.subr.bf16.mxu0 %v6315_v60  ;;  %4195 = vmatprep.subr.bf16.mxu1 %v6318_v61  ;;  %v6375_v60 = vld [vmem:[#allocation8 + $0x464] ss:$20 sps:$4 sm:$0xff]   ;;  %v6378_v61 = vld [vmem:[#allocation8 + $0x46c] ss:$20 sps:$4 sm:$0xff]  }
 0x266   :  { %4073 = vmatpush1.bf16.msra.mxu0 %v6313_v62  ;;  %4196 = vmatpush1.bf16.msra.mxu1 %v6316_v63  ;;  %v6373_v62 = vld [vmem:[#allocation8 + $0x460] ss:$20 sps:$4 sm:$0xff]   ;;  %v6376_v63 = vld [vmem:[#allocation8 + $0x468] ss:$20 sps:$4 sm:$0xff]  }
 0x267   :  { %4074 = vmatprep.subr.bf16.mxu0 %v6321_v0  ;;  %4197 = vmatprep.subr.bf16.mxu1 %v6324_v1  ;;  %v515_v0 = vsub.s32 2, %v6913_v33  ;;  %v6381_v1 = vld [vmem:[#allocation8 + $0x48c] ss:$20 sps:$4 sm:$0xff]  }
 0x26a   :  { %4075 = vmatpush1.bf16.msra.mxu0 %v6319_v2  ;;  %4198 = vmatpush1.bf16.msra.mxu1 %v6322_v3  ;;  %v6384_v2 = vld [vmem:[#allocation8 + $0x494] ss:$20 sps:$4 sm:$0xff]  }
 0x26b   :  { %4076 = vmatprep.subr.bf16.mxu0 %v6327_v4  ;;  %4199 = vmatprep.subr.bf16.mxu1 %v6330_v6  ;;  %v6379_v3 = vld [vmem:[#allocation8 + $0x488] ss:$20 sps:$4 sm:$0xff]   ;;  %v6382_v4 = vld [vmem:[#allocation8 + $0x490] ss:$20 sps:$4 sm:$0xff]   ;;  %v516_v6 = vrot.slane %v6916_v35, %v515_v0 }
 0x26e   :  { %4077 = vmatpush1.bf16.msra.mxu0 %v6325_v7  ;;  %4200 = vmatpush1.bf16.msra.mxu1 %v6328_v8  ;;  %v6387_v7 = vld [vmem:[#allocation8 + $0x4b4] ss:$20 sps:$4 sm:$0xff]   ;;  %v6390_v8 = vld [vmem:[#allocation8 + $0x4bc] ss:$20 sps:$4 sm:$0xff]  }
 0x26f   :  { %4078 = vmatprep.subr.bf16.mxu0 %v6333_v5  ;;  %4201 = vmatprep.subr.bf16.mxu1 %v6336_v9  ;;  %v6385_v5 = vld [vmem:[#allocation8 + $0x4b0] ss:$20 sps:$4 sm:$0xff]   ;;  %v6388_v9 = vld [vmem:[#allocation8 + $0x4b8] ss:$20 sps:$4 sm:$0xff]  }
 0x272   :  { %4079 = vmatpush1.bf16.msra.mxu0 %v6331_v10  ;;  %4202 = vmatpush1.bf16.msra.mxu1 %v6334_v11  ;;  %v5688_v10 = vadd.f32 %v6929_v41, %v516_v6  ;;  %v6393_v11 = vld [vmem:[#allocation8 + $0x4dc] ss:$20 sps:$4 sm:$0xff]   ;;  %v6402_v41 = vld [vmem:[#allocation8 + $0x50c] ss:$20 sps:$4 sm:$0xff]   ;;  %v6444_v6 = vld [vmem:[#allocation8 + $0x624] ss:$20 sps:$4 sm:$0xff]  }
 0x273   :  { %4080 = vmatprep.subr.bf16.mxu0 %v6339_v12  ;;  %4203 = vmatprep.subr.bf16.mxu1 %v6342_v14  ;;  %v6396_v12 = vld [vmem:[#allocation8 + $0x4e4] ss:$20 sps:$4 sm:$0xff]  }
 0x274   :  { %v5468_v19 = vpop.f32.mrb[4].mxu0  ;;  %v5490_v23 = vpop.f32.mrb[4].mxu1 }
 0x275   :  { %v5469_v24 = vpop.f32.mrb[5].mxu0  ;;  %v5491_v26 = vpop.f32.mrb[5].mxu1 }
 0x276   :  { %4081 = vmatpush1.bf16.msra.mxu0 %v6337_v15  ;;  %4204 = vmatpush1.bf16.msra.mxu1 %v6340_v25  ;;  %v5470_v29 = vadd.f32 %v5469_v24, %v5468_v19  ;;  %v5471_v31 = vpop.f32.mrb[6].mxu0  ;;  %v5492_v37 = vadd.f32 %v5491_v26, %v5490_v23  ;;  %v5493_v38 = vpop.f32.mrb[6].mxu1  ;;  %v6399_v23 = vld [vmem:[#allocation8 + $0x504] ss:$20 sps:$4 sm:$0xff]  }
 0x277   :  { %4082 = vmatprep.subr.bf16.mxu0 %v6345_v17  ;;  %4205 = vmatprep.subr.bf16.mxu1 %v6348_v18  ;;  %v5472_v42 = vpop.f32.mrb[7].mxu0  ;;  %v5494_v43 = vpop.f32.mrb[7].mxu1  ;;  %v6391_v18 = vld [vmem:[#allocation8 + $0x4d8] ss:$20 sps:$4 sm:$0xff]   ;;  %v6397_v38 = vld [vmem:[#allocation8 + $0x500] ss:$20 sps:$4 sm:$0xff]  }
 0x278   :  { %v2585_v44 = vadd.f32 %v5470_v29, %v524_v22  ;;  %v6394_v22 = vld [vmem:[#allocation8 + $0x4e0] ss:$20 sps:$4 sm:$0xff]  }
 0x279   :  { %v6405_v42 = vld [vmem:[#allocation8 + $0x52c] ss:$20 sps:$4 sm:$0xff]   ;;  %v6408_v43 = vld [vmem:[#allocation8 + $0x534] ss:$20 sps:$4 sm:$0xff]  }
 0x27a   :  { %4083 = vmatpush1.bf16.msra.mxu0 %v6343_v13  ;;  %4206 = vmatpush1.bf16.msra.mxu1 %v6346_v27  ;;  %v6947_v28 = vadd.f32 %v5492_v37, %v2585_v44  ;;  %v2712_v13 = vmax.f32 %v5688_v10, 0.0  ;;  %v6403_v44 = vld [vmem:[#allocation8 + $0x528] ss:$20 sps:$4 sm:$0xff]   ;;  %v6446_v10 = vld [vmem:[#allocation8 + $0x3d0] ss:$20 sps:$4 sm:$0xff]  }
 0x27b   :  { %4084 = vmatprep.subr.bf16.mxu0 %v6351_v39  ;;  %4207 = vmatprep.subr.bf16.mxu1 %v6354_v40  ;;  %v6400_v39 = vld [vmem:[#allocation8 + $0x508] ss:$20 sps:$4 sm:$0xff]  }
 0x27c   :  { %v6957_v40 = vpack.c.bf16 %v2712_v13, %v2712_v13  ;;  %v6459_v13 = vld [vmem:[#allocation8 + $0x88] ss:$20 sps:$4 sm:$0xff]  }
 0x27e   :  { %4085 = vmatpush1.bf16.msra.mxu0 %v6349_v45  ;;  %4208 = vmatpush1.bf16.msra.mxu1 %v6352_v20  ;;  %v6406_v45 = vld [vmem:[#allocation8 + $0x530] ss:$20 sps:$4 sm:$0xff]   ;;  %v6411_v20 = vld [vmem:[#allocation8 + $0x554] ss:$20 sps:$4 sm:$0xff]  }
 0x27f   :  { %4086 = vmatprep.subr.bf16.mxu0 %v6357_v48  ;;  %4209 = vmatprep.subr.bf16.mxu1 %v6360_v30  ;;  %v6726_v48 = vmov 0   ;;  %v6409_v30 = vld [vmem:[#allocation8 + $0x550] ss:$20 sps:$4 sm:$0xff]  }
 0x282   :  { %4087 = vmatpush1.bf16.msra.mxu0 %v6355_v46  ;;  %4210 = vmatpush1.bf16.msra.mxu1 %v6358_v47  ;;  %v6412_v46 = vld [vmem:[#allocation8 + $0x558] ss:$20 sps:$4 sm:$0xff]   ;;  %v6417_v47 = vld [vmem:[#allocation8 + $0x57c] ss:$20 sps:$4 sm:$0xff]  }
 0x283   :  { %4088 = vmatprep.subr.bf16.mxu0 %v6363_v49  ;;  %4211 = vmatprep.subr.bf16.mxu1 %v6366_v50  ;;  %v6420_v49 = vld [vmem:[#allocation8 + $0x584] ss:$20 sps:$4 sm:$0xff]  }
 0x284   :  { %v6415_v50 = vld [vmem:[#allocation8 + $0x578] ss:$20 sps:$4 sm:$0xff]  }
 0x286   :  { %4089 = vmatpush1.bf16.msra.mxu0 %v6361_v52  ;;  %4212 = vmatpush1.bf16.msra.mxu1 %v6364_v53  ;;  %v6418_v52 = vld [vmem:[#allocation8 + $0x580] ss:$20 sps:$4 sm:$0xff]   ;;  %v6423_v53 = vld [vmem:[#allocation8 + $0x5a4] ss:$20 sps:$4 sm:$0xff]  }
 0x287   :  { %4090 = vmatprep.subr.bf16.mxu0 %v6369_v55  ;;  %4213 = vmatprep.subr.bf16.mxu1 %v6372_v56  ;;  %v6426_v55 = vld [vmem:[#allocation8 + $0x5ac] ss:$20 sps:$4 sm:$0xff]  }
 0x288   :  { %v6421_v56 = vld [vmem:[#allocation8 + $0x5a0] ss:$20 sps:$4 sm:$0xff]  }
 0x28a   :  { %4091 = vmatpush1.bf16.msra.mxu0 %v6367_v58  ;;  %4214 = vmatpush1.bf16.msra.mxu1 %v6370_v59  ;;  %v6424_v58 = vld [vmem:[#allocation8 + $0x5a8] ss:$20 sps:$4 sm:$0xff]   ;;  %v6429_v59 = vld [vmem:[#allocation8 + $0x5cc] ss:$20 sps:$4 sm:$0xff]  }
 0x28b   :  { %4092 = vmatprep.subr.bf16.mxu0 %v6375_v60  ;;  %4215 = vmatprep.subr.bf16.mxu1 %v6378_v61  ;;  %v6432_v60 = vld [vmem:[#allocation8 + $0x5d4] ss:$20 sps:$4 sm:$0xff]  }
 0x28c   :  { %v6427_v61 = vld [vmem:[#allocation8 + $0x5c8] ss:$20 sps:$4 sm:$0xff]  }
 0x28e   :  { %4093 = vmatpush1.bf16.msra.mxu0 %v6373_v62  ;;  %4216 = vmatpush1.bf16.msra.mxu1 %v6376_v63  ;;  %v6430_v62 = vld [vmem:[#allocation8 + $0x5d0] ss:$20 sps:$4 sm:$0xff]   ;;  %v6435_v63 = vld [vmem:[#allocation8 + $0x5f4] ss:$20 sps:$4 sm:$0xff]  }
 0x28f   :  { %4094 = vmatprep.subr.bf16.mxu0 %v6381_v1  ;;  %4217 = vmatprep.subr.bf16.mxu1 %v6384_v2  ;;  %v6438_v1 = vld [vmem:[#allocation8 + $0x5fc] ss:$20 sps:$4 sm:$0xff]  }
 0x290   :  { %v6433_v2 = vld [vmem:[#allocation8 + $0x5f0] ss:$20 sps:$4 sm:$0xff]  }
 0x292   :  { %4095 = vmatpush1.bf16.msra.mxu0 %v6379_v3  ;;  %4218 = vmatpush1.bf16.msra.mxu1 %v6382_v4  ;;  %v6436_v3 = vld [vmem:[#allocation8 + $0x5f8] ss:$20 sps:$4 sm:$0xff]   ;;  %v6441_v4 = vld [vmem:[#allocation8 + $0x61c] ss:$20 sps:$4 sm:$0xff]  }
 0x293   :  { %4096 = vmatprep.subr.bf16.mxu0 %v6387_v7  ;;  %4219 = vmatprep.subr.bf16.mxu1 %v6390_v8  ;;  %v6439_v7 = vld [vmem:[#allocation8 + $0x618] ss:$20 sps:$4 sm:$0xff]   ;;  %v6442_v8 = vld [vmem:[#allocation8 + $0x620] ss:$20 sps:$4 sm:$0xff]  }
 0x294   :  { %v5512_v14 = vpop.f32.mrb[8].mxu0  ;;  %v5534_v15 = vpop.f32.mrb[8].mxu1 }
 0x295   :  { %v5513_v25 = vpop.f32.mrb[9].mxu0  ;;  %v5535_v17 = vpop.f32.mrb[9].mxu1 }
 0x296   :  { %4097 = vmatpush1.bf16.msra.mxu0 %v6385_v5  ;;  %4220 = vmatpush1.bf16.msra.mxu1 %v6388_v9  ;;  %v5514_v35 = vadd.f32 %v5513_v25, %v5512_v14  ;;  %v5536_v19 = vadd.f32 %v5535_v17, %v5534_v15  ;;  %v5515_v24 = vpop.f32.mrb[10].mxu0  ;;  %v5537_v26 = vpop.f32.mrb[10].mxu1  ;;  %v6445_v9 = vld [vmem:[#allocation8 + $0x150] ss:$20 sps:$4 sm:$0xff]   ;;  %v6449_v15 = vld [vmem:[#allocation8 + $0x178] ss:$20 sps:$4 sm:$0xff]  }
 0x297   :  { %4098 = vmatprep.subr.bf16.mxu0 %v6393_v11  ;;  %4221 = vmatprep.subr.bf16.mxu1 %v6396_v12  ;;  %v5516_v27 = vpop.f32.mrb[11].mxu0  ;;  %v5538_v29 = vpop.f32.mrb[11].mxu1  ;;  %v6447_v11 = vld [vmem:[#allocation8 + $0x10] ss:$20 sps:$4 sm:$0xff]   ;;  %v6450_v25 = vld [vmem:[#allocation8 + $0x3f8] ss:$20 sps:$4 sm:$0xff]  }
 0x298   :  { %v2665_v31 = vadd.f32 %v5514_v35, %v6947_v28  ;;  %v6414_v28 = vld [vmem:[#allocation8 + $0x55c] ss:$20 sps:$4 sm:$0xff]   ;;  %v6451_v17 = vld [vmem:[#allocation8 + $0x38] ss:$20 sps:$4 sm:$0xff]   ;;  %v6453_v35 = vld [vmem:[#allocation8 + $0x1a0] ss:$20 sps:$4 sm:$0xff]  }
 0x299   :  { %v6448_v14 = vld [vmem:[#allocation8 + $0x290] ss:$20 sps:$4 sm:$0xff]   ;;  %v6457_v24 = vld [vmem:[#allocation8 + $0x1c8] ss:$20 sps:$4 sm:$0xff]  }
 0x29a   :  { %v6955_v37 = vadd.f32 %v5536_v19, %v2665_v31  ;;  %4099 = vmatpush1.bf16.msra.mxu0 %v6391_v18  ;;  %4222 = vmatpush1.bf16.msra.mxu1 %v6394_v22  ;;  %v6452_v18 = vld [vmem:[#allocation8 + $0x2b8] ss:$20 sps:$4 sm:$0xff]   ;;  %v6454_v19 = vld [vmem:[#allocation8 + $0x420] ss:$20 sps:$4 sm:$0xff]   ;;  %v6458_v26 = vld [vmem:[#allocation8 + $0x448] ss:$20 sps:$4 sm:$0xff]  }
 0x29b   :  { %4109 = vmatprep.subr.bf16.mxu0 %v6399_v23  ;;  %4232 = vmatprep.subr.bf16.mxu1 %v6402_v41  ;;  %v6455_v22 = vld [vmem:[#allocation8 + $0x60] ss:$20 sps:$4 sm:$0xff]   ;;  %v6461_v41 = vld [vmem:[#allocation8 + $0x1f0] ss:$20 sps:$4 sm:$0xff]   ;;  %v6465_v31 = vld [vmem:[#allocation8 + $0x218] ss:$20 sps:$4 sm:$0xff]  }
 0x29c   :  { %v2714_v5 = vmax.f32 %v6955_v37, 0.0  ;;  %v6456_v23 = vld [vmem:[#allocation8 + $0x2e0] ss:$20 sps:$4 sm:$0xff]   ;;  %v6463_v27 = vld [vmem:[#allocation8 + $0xb0] ss:$20 sps:$4 sm:$0xff]  }
 0x29d   :  { %4101 = vmatmul.mubr.bf16.vlgmr.msra.gmra.mrb[12].mxu0 %v6957_v40  ;;  %4224 = vmatmul.mubr.bf16.vlgmr.msra.gmra.mrb[12].mxu1 %v6957_v40  ;;  %v6464_v29 = vld [vmem:[#allocation8 + $0x330] ss:$20 sps:$4 sm:$0xff]   ;;  %v6466_v37 = vld [vmem:[#allocation8 + $0x498] ss:$20 sps:$4 sm:$0xff]  }
 0x29e   :  { %4110 = vmatpush1.bf16.msra.mxu0 %v6397_v38  ;;  %4233 = vmatpush1.bf16.msra.mxu1 %v6400_v39  ;;  %v6962_v12 = vpack.c.bf16 %v2714_v5, %v2714_v5  ;;  %v6467_v38 = vld [vmem:[#allocation8 + $0xd8] ss:$20 sps:$4 sm:$0xff]  }
 0x29f   :  { %4111 = vmatprep.subr.bf16.mxu0 %v6405_v42  ;;  %4234 = vmatprep.subr.bf16.mxu1 %v6408_v43  ;;  %v6468_v39 = vld [vmem:[#allocation8 + $0x358] ss:$20 sps:$4 sm:$0xff]   ;;  %v6469_v42 = vld [vmem:[#allocation8 + $0x240] ss:$20 sps:$4 sm:$0xff]  }
 0x2a0   :  { %4141 = vmatprep.mubr.bf16.mxu0 %v6726_v48  ;;  %4264 = vmatprep.mubr.bf16.mxu1 %v6726_v48  ;;  %v6470_v43 = vld [vmem:[#allocation8 + $0x4c0] ss:$20 sps:$4 sm:$0xff]   ;;  %v6475_v48 = vld [vmem:[#allocation8 + $0x128] ss:$20 sps:$4 sm:$0xff]  }
 0x2a1   :  { %v6490_v5 = vld [vmem:[#allocation11 + $0xc8] sm:$0xff]  }
 0x2a2   :  { %4112 = vmatpush1.bf16.msra.mxu0 %v6403_v44  ;;  %4235 = vmatpush1.bf16.msra.mxu1 %v6406_v45  ;;  %v6471_v44 = vld [vmem:[#allocation8 + $0x100] ss:$20 sps:$4 sm:$0xff]  }
 0x2a3   :  { %4113 = vmatprep.subr.bf16.mxu0 %v6411_v20  ;;  %4236 = vmatprep.subr.bf16.mxu1 %v6414_v28  ;;  %v6472_v45 = vld [vmem:[#allocation8 + $0x380] ss:$20 sps:$4 sm:$0xff]   ;;  %v6473_v20 = vld [vmem:[#allocation8 + $0x268] ss:$20 sps:$4 sm:$0xff]  }
 0x2a4   :  { %v6474_v28 = vld [vmem:[#allocation8 + $0x4e8] ss:$20 sps:$4 sm:$0xff]  }
 0x2a6   :  { %4114 = vmatpush1.bf16.msra.mxu0 %v6409_v30  ;;  %4237 = vmatpush1.bf16.msra.mxu1 %v6412_v46  ;;  %v6476_v30 = vld [vmem:[#allocation8 + $0x3a8] ss:$20 sps:$4 sm:$0xff]  }
 0x2a7   :  { %4115 = vmatprep.subr.bf16.mxu0 %v6417_v47  ;;  %4238 = vmatprep.subr.bf16.mxu1 %v6420_v49  ;;  %v6485_v46 = vld [vmem:[#allocation11 + $0x40] sm:$0xff]   ;;  %v6727_v49 = vmov 0.0  }
 0x2a8   :  { %v6477_v47 = vld [vmem:[#allocation8 + $0x510] ss:$20 sps:$4 sm:$0xff]  }
 0x2aa   :  { %4116 = vmatpush1.bf16.msra.mxu0 %v6415_v50  ;;  %4239 = vmatpush1.bf16.msra.mxu1 %v6418_v52  ;;  %v6487_v50 = vld [vmem:[#allocation11] sm:$0xff]   ;;  %v6489_v52 = vld [vmem:[#allocation11 + $0x48] sm:$0xff]  }
 0x2ab   :  { %4117 = vmatprep.subr.bf16.mxu0 %v6423_v53  ;;  %4240 = vmatprep.subr.bf16.mxu1 %v6426_v55  ;;  %v6478_v53 = vld [vmem:[#allocation8 + $0x538] ss:$20 sps:$4 sm:$0xff]  }
 0x2ac   :  { %v6491_v55 = vld [vmem:[#allocation11 + $0x8] sm:$0xff]  }
 0x2ae   :  { %4118 = vmatpush1.bf16.msra.mxu0 %v6421_v56  ;;  %4241 = vmatpush1.bf16.msra.mxu1 %v6424_v58  ;;  %v6493_v56 = vld [vmem:[#allocation11 + $0x50] sm:$0xff]  }
 0x2af   :  { %4119 = vmatprep.subr.bf16.mxu0 %v6429_v59  ;;  %4242 = vmatprep.subr.bf16.mxu1 %v6432_v60  ;;  %v6479_v58 = vld [vmem:[#allocation8 + $0x560] ss:$20 sps:$4 sm:$0xff]   ;;  %v6480_v59 = vld [vmem:[#allocation8 + $0x588] ss:$20 sps:$4 sm:$0xff]  }
 0x2b0   :  { %v6499_v60 = vld [vmem:[#allocation11 + $0x18] sm:$0xff]  }
 0x2b2   :  { %4120 = vmatpush1.bf16.msra.mxu0 %v6427_v61  ;;  %4243 = vmatpush1.bf16.msra.mxu1 %v6430_v62  ;;  %v6501_v61 = vld [vmem:[#allocation11 + $0x60] sm:$0xff]  }
 0x2b3   :  { %4121 = vmatprep.subr.bf16.mxu0 %v6435_v63  ;;  %4244 = vmatprep.subr.bf16.mxu1 %v6438_v1  ;;  %v6481_v62 = vld [vmem:[#allocation8 + $0x5b0] ss:$20 sps:$4 sm:$0xff]  }
 0x2b4   :  { %v6503_v63 = vld [vmem:[#allocation11 + $0x20] sm:$0xff]   ;;  %v6505_v1 = vld [vmem:[#allocation11 + $0x68] sm:$0xff]  }
 0x2b6   :  { %4122 = vmatpush1.bf16.msra.mxu0 %v6433_v2  ;;  %4245 = vmatpush1.bf16.msra.mxu1 %v6436_v3  ;;  %v6482_v2 = vld [vmem:[#allocation8 + $0x5d8] ss:$20 sps:$4 sm:$0xff]  }
 0x2b7   :  { %4123 = vmatprep.subr.bf16.mxu0 %v6441_v4  ;;  %4246 = vmatprep.subr.bf16.mxu1 %v6444_v6  ;;  %v6507_v3 = vld [vmem:[#allocation11 + $0x28] sm:$0xff]   ;;  %v6484_v6 = vld [vmem:[#allocation8 + $0x628] ss:$20 sps:$4 sm:$0xff]  }
 0x2b8   :  { %v6483_v4 = vld [vmem:[#allocation8 + $0x600] ss:$20 sps:$4 sm:$0xff]  }
 0x2ba   :  { %4124 = vmatpush1.bf16.msra.mxu0 %v6439_v7  ;;  %4247 = vmatpush1.bf16.msra.mxu1 %v6442_v8  ;;  %v6486_v7 = vld [vmem:[#allocation11 + $0xc0] sm:$0xff]  }
 0x2bb   :  { %5540 = vmatprep.subr.bf16.mxu0 %v6445_v9  ;;  %5562 = vmatprep.subr.bf16.mxu1 %v6446_v10  ;;  %v6488_v8 = vld [vmem:[#allocation11 + $0x80] sm:$0xff]   ;;  %v6492_v9 = vld [vmem:[#allocation11 + $0x88] sm:$0xff]   ;;  %v6494_v10 = vld [vmem:[#allocation11 + $0xd0] sm:$0xff]  }
 0x2bd   :  { %4142 = vmatmul.mubr.bf16.vlgmr.msra.gmra.mrb[12].mxu0 %v6962_v12  ;;  %4265 = vmatmul.mubr.bf16.vlgmr.msra.gmra.mrb[12].mxu1 %v6962_v12 }
 0x2be   :  { %5541 = vmatpush3.bf16.msra.mxu0 %v6447_v11  ;;  %4305 = vmatprep.mubr.bf16.mxu0 %v6931_v51  ;;  %v6460_v51 = vld [vmem:[#allocation8 + $0x308] ss:$20 sps:$4 sm:$0xff]  }
 0x2bf   :  { %5563 = vmatpush3.bf16.msra.mxu1 %v6448_v14  ;;  %4345 = vmatprep.mubr.bf16.mxu1 %v6937_v57  ;;  %v6462_v57 = vld [vmem:[#allocation8 + $0x470] ss:$20 sps:$4 sm:$0xff]   ;;  %v6496_v11 = vld [vmem:[#allocation11 + $0x90] sm:$0xff]  }
 0x2c0   :  { %5542 = vmatprep.subr.bf16.mxu0 %v6449_v15  ;;  %5564 = vmatprep.subr.bf16.mxu1 %v6450_v25  ;;  %v6498_v14 = vld [vmem:[#allocation11 + $0xd8] sm:$0xff]   ;;  %v6502_v25 = vld [vmem:[#allocation11 + $0xe0] sm:$0xff]  }
 0x2c1   :  { %v6500_v15 = vld [vmem:[#allocation11 + $0x98] sm:$0xff]  }
 0x2c2   :  { %5543 = vmatpush3.bf16.msra.mxu0 %v6451_v17  ;;  %v6504_v17 = vld [vmem:[#allocation11 + $0xa0] sm:$0xff]  }
 0x2c3   :  { %5565 = vmatpush3.bf16.msra.mxu1 %v6452_v18  ;;  %5544 = vmatprep.subr.bf16.mxu0 %v6453_v35  ;;  %v6506_v18 = vld [vmem:[#allocation11 + $0xe8] sm:$0xff]  }
 0x2c4   :  { %5566 = vmatprep.subr.bf16.mxu1 %v6454_v19  ;;  %v6508_v35 = vld [vmem:[#allocation11 + $0xa8] sm:$0xff]   ;;  %v6510_v19 = vld [vmem:[#allocation11 + $0xf0] sm:$0xff]  }
 0x2c6   :  { %5545 = vmatpush3.bf16.msra.mxu0 %v6455_v22  ;;  %v6511_v22 = vld [vmem:[#allocation11 + $0x30] sm:$0xff]  }
 0x2c7   :  { %5567 = vmatpush3.bf16.msra.mxu1 %v6456_v23  ;;  %5546 = vmatprep.subr.bf16.mxu0 %v6457_v24  ;;  %v6512_v23 = vld [vmem:[#allocation11 + $0xb0] sm:$0xff]   ;;  %v6513_v24 = vld [vmem:[#allocation11 + $0x78] sm:$0xff]  }
 0x2c8   :  { %5568 = vmatprep.subr.bf16.mxu1 %v6458_v26  ;;  %v6514_v26 = vld [vmem:[#allocation11 + $0xf8] sm:$0xff]  }
 0x2ca   :  { %5547 = vmatpush3.bf16.msra.mxu0 %v6459_v13  ;;  %v6515_v13 = vld [vmem:[#allocation11 + $0x38] sm:$0xff]  }
 0x2cb   :  { %5569 = vmatpush3.bf16.msra.mxu1 %v6460_v51  ;;  %5548 = vmatprep.subr.bf16.mxu0 %v6461_v41  ;;  %v6516_v51 = vld [vmem:[#allocation11 + $0xb8] sm:$0xff]  }
 0x2cc   :  { %5570 = vmatprep.subr.bf16.mxu1 %v6462_v57  ;;  %v2960_v41 = vld [vmem:[#allocation10] sm:$0x1f] }
 0x2cd   :  { %v2965_v57 = vrot.slane %v2960_v41, %v507_v34 }
 0x2ce   :  { %5549 = vmatpush3.bf16.msra.mxu0 %v6463_v27  ;;  %v2973_v27 = vrot.slane %v2960_v41, %v515_v0 }
 0x2cf   :  { %5571 = vmatpush3.bf16.msra.mxu1 %v6464_v29  ;;  %5550 = vmatprep.subr.bf16.mxu0 %v6465_v31  ;;  %v2969_v29 = vrot.slane %v2960_v41, %v511_v36  ;;  %v2977_v31 = vrot.slane %v2960_v41, %v519_v21 }
 0x2d0   :  { %5572 = vmatprep.subr.bf16.mxu1 %v6466_v37 }
 0x2d2   :  { %5551 = vmatpush3.bf16.msra.mxu0 %v6467_v38 }
 0x2d3   :  { %5573 = vmatpush3.bf16.msra.mxu1 %v6468_v39  ;;  %5552 = vmatprep.subr.bf16.mxu0 %v6469_v42 }
 0x2d4   :  { %5574 = vmatprep.subr.bf16.mxu1 %v6470_v43 }
 0x2d6   :  { %5553 = vmatpush3.bf16.msra.mxu0 %v6471_v44 }
 0x2d7   :  { %5575 = vmatpush3.bf16.msra.mxu1 %v6472_v45  ;;  %5554 = vmatprep.subr.bf16.mxu0 %v6473_v20 }
 0x2d8   :  { %5576 = vmatprep.subr.bf16.mxu1 %v6474_v28 }
 0x2da   :  { %5555 = vmatpush3.bf16.msra.mxu0 %v6475_v48 }
 0x2db   :  { %5577 = vmatpush3.bf16.msra.mxu1 %v6476_v30  ;;  %5646 = vmatprep.subr.bf16.mxu0 %v6727_v49 }
 0x2dc   :  { %5593 = vmatprep.subr.bf16.mxu1 %v6485_v46 }
 0x2dd   :  { %4306 = vmatmul.mubr.bf16.vlgmr.msra.gmra.mrb[16].mxu0 %v6933_v54  ;;  %v6495_v54 = vld [vmem:[#allocation11 + $0x10] sm:$0xff]  }
 0x2de   :  { %4346 = vmatmul.mubr.bf16.vlgmr.msra.gmra.mrb[16].mxu1 %v6957_v40  ;;  %5647 = vmatpush3.bf16.msra.mxu0 %v6477_v47  ;;  %v6497_v40 = vld [vmem:[#allocation11 + $0x58] sm:$0xff]  }
 0x2df   :  { %5648 = vmatprep.subr.bf16.mxu0 %v6727_v49  ;;  %5662 = vmatprep.mubr.msk.bf16.mxu0 %vm6728_vm0, %v6727_v49 }
 0x2e0   :  { %5594 = vmatpush3.bf16.msra.mxu1 %v6487_v50 }
 0x2e1   :  { %5595 = vmatprep.subr.bf16.mxu1 %v6489_v52 }
 0x2e2   :  { %5649 = vmatpush3.bf16.msra.mxu0 %v6478_v53  ;;  %v6517_v53 = vld [vmem:[#allocation11 + $0x100] sm:$0xff]  }
 0x2e3   :  { %5650 = vmatprep.subr.bf16.mxu0 %v6727_v49 }
 0x2e4   :  { %5596 = vmatpush3.bf16.msra.mxu1 %v6491_v55 }
 0x2e5   :  { %5597 = vmatprep.subr.bf16.mxu1 %v6493_v56  ;;  %v6518_v56 = vld [vmem:[#allocation11 + $0x108] sm:$0xff]  }
 0x2e6   :  { %5651 = vmatpush3.bf16.msra.mxu0 %v6479_v58  ;;  %v6519_v58 = vld [vmem:[#allocation11 + $0x110] sm:$0xff]  }
 0x2e7   :  { %5652 = vmatprep.subr.bf16.mxu0 %v6727_v49 }
 0x2e8   :  { %5598 = vmatpush3.bf16.msra.mxu1 %v6495_v54  ;;  %v6520_v54 = vld [vmem:[#allocation11 + $0x118] sm:$0xff]  }
 0x2e9   :  { %5599 = vmatprep.subr.bf16.mxu1 %v6497_v40  ;;  %v6521_v40 = vld [vmem:[#allocation11 + $0x120] sm:$0xff]  }
 0x2ea   :  { %5653 = vmatpush3.bf16.msra.mxu0 %v6480_v59  ;;  %v6522_v59 = vld [vmem:[#allocation11 + $0x128] sm:$0xff]  }
 0x2eb   :  { %5654 = vmatprep.subr.bf16.mxu0 %v6727_v49 }
 0x2ec   :  { %5600 = vmatpush3.bf16.msra.mxu1 %v6499_v60  ;;  %v6523_v60 = vld [vmem:[#allocation11 + $0x130] sm:$0xff]  }
 0x2ed   :  { %5601 = vmatprep.subr.bf16.mxu1 %v6501_v61 }
 0x2ee   :  { %5655 = vmatpush3.bf16.msra.mxu0 %v6481_v62  ;;  %v2981_v62 = vrot.slane %v2960_v41, %v523_v16 }
 0x2ef   :  { %5656 = vmatprep.subr.bf16.mxu0 %v6727_v49 }
 0x2f0   :  { %5602 = vmatpush3.bf16.msra.mxu1 %v6503_v63 }
 0x2f1   :  { %5603 = vmatprep.subr.bf16.mxu1 %v6505_v1 }
 0x2f2   :  { %5657 = vmatpush3.bf16.msra.mxu0 %v6482_v2 }
 0x2f3   :  { %5658 = vmatprep.subr.bf16.mxu0 %v6727_v49 }
 0x2f4   :  { %5604 = vmatpush3.bf16.msra.mxu1 %v6507_v3 }
 0x2f6   :  { %5659 = vmatpush3.bf16.msra.mxu0 %v6483_v4 }
 0x2f7   :  { %5660 = vmatprep.subr.bf16.mxu0 %v6727_v49 }
 0x2fa   :  { %5661 = vmatpush3.bf16.msra.mxu0 %v6484_v6  ;;  %v6524_v6 = vld [vmem:[#allocation11 + $0x138] sm:$0xff]  }
 0x2fb   :  { %5615 = vmatprep.subr.bf16.mxu0 %v6486_v7 }
 0x2fd   :  { %5663 = vmatmul.mubr.bf16.vlgmr.msra.gmra.mrb[20].mxu0 %v6962_v12  ;;  %v6509_v12 = vld [vmem:[#allocation11 + $0x70] sm:$0xff]  }
 0x2fe   :  { %5616 = vmatpush3.bf16.msra.mxu0 %v6488_v8  ;;  %5605 = vmatprep.subr.bf16.mxu1 %v6509_v12 }
 0x2ff   :  { %5617 = vmatprep.subr.bf16.mxu0 %v6490_v5  ;;  %5606 = vmatpush3.bf16.msra.mxu1 %v6511_v22 }
 0x300   :  { %5607 = vmatprep.subr.bf16.mxu1 %v6513_v24 }
 0x302   :  { %5618 = vmatpush3.bf16.msra.mxu0 %v6492_v9 }
 0x303   :  { %5619 = vmatprep.subr.bf16.mxu0 %v6494_v10  ;;  %5608 = vmatpush3.bf16.msra.mxu1 %v6515_v13 }
 0x304   :  { %5666 = vmatprep.subr.bf16.mxu1 %v6727_v49 }
 0x306   :  { %5620 = vmatpush3.bf16.msra.mxu0 %v6496_v11 }
 0x307   :  { %5621 = vmatprep.subr.bf16.mxu0 %v6498_v14 }
 0x30a   :  { %5622 = vmatpush3.bf16.msra.mxu0 %v6500_v15 }
 0x30b   :  { %5623 = vmatprep.subr.bf16.mxu0 %v6502_v25 }
 0x30e   :  { %5624 = vmatpush3.bf16.msra.mxu0 %v6504_v17 }
 0x30f   :  { %5625 = vmatprep.subr.bf16.mxu0 %v6506_v18 }
 0x312   :  { %5626 = vmatpush3.bf16.msra.mxu0 %v6508_v35 }
 0x313   :  { %5627 = vmatprep.subr.bf16.mxu0 %v6510_v19  ;;  %v5411_v19 = vld [vmem:[#allocation13] ss:$0 sm:$0xff] }
 0x316   :  { %5628 = vmatpush3.bf16.msra.mxu0 %v6512_v23 }
 0x317   :  { %5629 = vmatprep.subr.bf16.mxu0 %v6514_v26 }
 0x31a   :  { %5630 = vmatpush3.bf16.msra.mxu0 %v6516_v51 }
 0x390   :  { %v4143_v37 = vpop.f32.mrb[12].mxu0  ;;  %v4266_v38 = vpop.f32.mrb[12].mxu1 }
 0x391   :  { %v5690_v39 = vadd.f32 %v4143_v37, %v2965_v57  ;;  %v5692_v42 = vadd.f32 %v4266_v38, %v2973_v27  ;;  %v4145_v43 = vpop.f32.mrb[13].mxu0  ;;  %v4268_v44 = vpop.f32.mrb[13].mxu1 }
 0x392   :  { %v5691_v45 = vadd.f32 %v4145_v43, %v2969_v29  ;;  %v5693_v20 = vadd.f32 %v4268_v44, %v2977_v31  ;;  %v4147_v28 = vpop.f32.mrb[14].mxu0  ;;  %v4270_v48 = vpop.f32.mrb[14].mxu1  ;;  %v4851_v29 = vand.u32 127, %v505_v32 }
 0x393   :  { %v4393_v34 = vmax.f32 %v5690_v39, 0.0  ;;  %v4395_v30 = vmax.f32 %v5692_v42, 0.0  ;;  %v4148_v46 = vpop.f32.mrb[15].mxu0  ;;  %v4271_v0 = vpop.f32.mrb[15].mxu1 }
 0x394   :  { %v4394_v47 = vmax.f32 %v5691_v45, 0.0  ;;  %v4396_v50 = vmax.f32 %v5693_v20, 0.0  ;;  %vm4852_vm1 = vcmp.lt.s32.totalorder %v4851_v29, 16 }
 0x395   :  { %v4398_v21 = vpack.c.bf16 %v4393_v34, %v4393_v34  ;;  %v4400_v55 = vpack.c.bf16 %v4395_v30, %v4395_v30 }
 0x396   :  { %v4399_v36 = vpack.c.bf16 %v4394_v47, %v4394_v47  ;;  %v4401_v52 = vpack.c.bf16 %v4396_v50, %v4396_v50 }
 0x398   :  { %4762 = vmatprep.mubr.bf16.mxu1 %v4399_v36  ;;  %4802 = vmatprep.mubr.bf16.mxu0 %v4401_v52 }
 0x399   :  { %4763 = vmatmul.mubr.bf16.vlgmr.msra.gmra.mrb[20].mxu1 %v4398_v21  ;;  %4803 = vmatmul.mubr.bf16.vlgmr.msra.gmra.mrb[24].mxu0 %v4400_v55 }
 0x39a   :  { %5667 = vmatpush3.bf16.msra.mxu1 %v6517_v53  ;;  %5682 = vmatprep.mubr.msk.bf16.mxu1 %vm6728_vm0, %v6727_v49 }
 0x39b   :  { %5668 = vmatprep.subr.bf16.mxu1 %v6727_v49 }
 0x39e   :  { %5669 = vmatpush3.bf16.msra.mxu1 %v6518_v56 }
 0x39f   :  { %5670 = vmatprep.subr.bf16.mxu1 %v6727_v49 }
 0x3a2   :  { %5671 = vmatpush3.bf16.msra.mxu1 %v6519_v58 }
 0x3a3   :  { %5672 = vmatprep.subr.bf16.mxu1 %v6727_v49 }
 0x3a6   :  { %5673 = vmatpush3.bf16.msra.mxu1 %v6520_v54 }
 0x3a7   :  { %5674 = vmatprep.subr.bf16.mxu1 %v6727_v49 }
 0x3aa   :  { %5675 = vmatpush3.bf16.msra.mxu1 %v6521_v40 }
 0x3ab   :  { %5676 = vmatprep.subr.bf16.mxu1 %v6727_v49 }
 0x3ae   :  { %5677 = vmatpush3.bf16.msra.mxu1 %v6522_v59 }
 0x3af   :  { %5678 = vmatprep.subr.bf16.mxu1 %v6727_v49 }
 0x3b0   :  { %v5556_v61 = vpop.f32.mrb[16].mxu0 }
 0x3b1   :  { %v5578_v63 = vpop.f32.mrb[16].mxu1  ;;  %v5557_v1 = vpop.f32.mrb[17].mxu0 }
 0x3b2   :  { %v5558_v2 = vadd.f32 %v5557_v1, %v5556_v61  ;;  %v5579_v3 = vpop.f32.mrb[17].mxu1  ;;  %v5559_v4 = vpop.f32.mrb[18].mxu0  ;;  %5679 = vmatpush3.bf16.msra.mxu1 %v6523_v60 }
 0x3b3   :  { %v5580_v7 = vadd.f32 %v5579_v3, %v5578_v63  ;;  %v5581_v8 = vpop.f32.mrb[18].mxu1  ;;  %v5560_v5 = vpop.f32.mrb[19].mxu0  ;;  %5680 = vmatprep.subr.bf16.mxu1 %v6727_v49 }
 0x3b4   :  { %v4308_v9 = vadd.f32 %v5558_v2, %v2981_v62  ;;  %v5582_v10 = vpop.f32.mrb[19].mxu1 }
 0x3b6   :  { %v4348_v11 = vadd.f32 %v5580_v7, %v4308_v9  ;;  %5681 = vmatpush3.bf16.msra.mxu1 %v6524_v6 }
 0x3d0   :  { %v4387_v14 = vpop.f32.mrb[20].mxu0 }
 0x3d1   :  { %v4388_v15 = vadd.f32 %v4387_v14, %v4348_v11  ;;  %v5664_v33 = vpop.f32.mrb[21].mxu0 }
 0x3d2   :  { %v4390_v16 = vpop.f32.mrb[22].mxu0 }
 0x3d3   :  { %v4397_v25 = vmax.f32 %v4388_v15, 0.0  ;;  %v5665_v17 = vpop.f32.mrb[23].mxu0 }
 0x3d5   :  { %v4402_v18 = vpack.c.bf16 %v4397_v25, %v4397_v25 }
 0x3d7   :  { %5683 = vmatmul.mubr.bf16.vlgmr.msra.gmra.mrb[24].mxu1 %v4402_v18 }
 0x46c   :  { %v5609_v35 = vpop.f32.mrb[20].mxu1  ;;  %v5631_v12 = vpop.f32.mrb[24].mxu0 }
 0x46d   :  { %v5610_v22 = vpop.f32.mrb[21].mxu1  ;;  %v5632_v23 = vpop.f32.mrb[25].mxu0 }
 0x46e   :  { %v5611_v24 = vadd.f32 %v5610_v22, %v5609_v35  ;;  %v5633_v26 = vadd.f32 %v5632_v23, %v5631_v12  ;;  %v5612_v49 = vpop.f32.mrb[22].mxu1  ;;  %v5634_v13 = vpop.f32.mrb[26].mxu0 }
 0x46f   :  { %v5613_v51 = vpop.f32.mrb[23].mxu1  ;;  %v5635_v41 = vpop.f32.mrb[27].mxu0 }
 0x470   :  { %v4765_v57 = vadd.f32 %v5611_v24, %v5411_v19 }
 0x472   :  { %v4805_v27 = vadd.f32 %v5633_v26, %v4765_v57 }
 0x4aa   :  { %v4844_v31 = vpop.f32.mrb[24].mxu1 }
 0x4ab   :  { %v4845_v37 = vadd.f32 %v4844_v31, %v4805_v27  ;;  %v5684_v38 = vpop.f32.mrb[25].mxu1 }
 0x4ac   :  { %v4847_v39 = vpop.f32.mrb[26].mxu1 }
 0x4ad   :  { %v5685_v42 = vpop.f32.mrb[27].mxu1  ;;  %v4853_v43 = vsel %vm4852_vm1, %v4845_v37, -inf }
 0x4ae   :  { %4854 = vmax.xlane.f32.xlu0 %v4853_v43 }
 0x53b   :  { %v4855_v44 = vpop.xlane.xlu0 %4854 }
 0x53c   :  { %v4856_v45 = vsub.f32 %v4853_v43, %v4855_v44 }
 0x53e   :  { %v4857_v20 = vmul.f32 1.442695, %v4856_v45 }
 0x540   :  { %6525 = vpow2.f32 %v4857_v20 }
 0x54a   :  { %v6526_v28 = vpop.eup %6525 }
 0x54b   :  { %4859 = vadd.xlane.f32.xlu0 %v6526_v28 }
 0x5d8   :  { %v4860_v48 = vpop.xlane.xlu0 %4859 }
 0x5d9   :  { %6527 = vrcp.f32 %v4860_v48 }
 0x5e3   :  { %v6528_v34 = vpop.eup %6527 }
 0x5e4   :  { %v4862_v32 = vmul.f32 %v6528_v34, %v6526_v28 }
 0x5e6   :  { %v4863_v30 = vadd.f32 1e-08, %v4862_v32 }
 0x5e8   :  { %4864 = vst [vmem:[#allocation14] sm:$0xff] %v4863_v30 }
 0x5e9   :  { %6694 = shalt.err (!%p6691_p4)
}
 0x5ea   :  { %s6695_s15 = scalar_lea.hbm %s7021_s7, 128 }
 0x5eb   :  { %p6696_p5 = scmp.ne.s32.totalorder %s7021_s7, %s6695_s15  ;;  %p6699_p6 = scmp.lt.u32.totalorder %s6695_s15, %s7021_s7 }
 0x5ed   :  { %p6701_p7 = pnand %p6699_p6, %p6696_p5 }
 0x5ef   :  { %6704 = shalt.err (!%p6701_p7)
}
 0x5f0   :  { %4874 = dma.vmem_to_hbm [thread:$0]  %s4872_s3, 128, %s7021_s7, [#allocation4]  }
 0x5f1   :  { %6713 = dma.done.wait [#allocation4], 128  }
 0x5f2   :  { %6714 = vsyncadd [#allocation4], 4294967168 }
 0x5f3   :  { %4878 = vsyncpa [#allocation3], 1 }
 0x5f4   :  { %4879 = vsyncpa [#allocation6], 1 }
 0x5f5   :  { %4880 = vsyncpa [#allocation9], 1 }
 0x5f6   :  { %4881 = vsyncpa [#allocation12], 1 }
 0x5f7   :  { %4882 = vsyncpa [#allocation4], 1 }

</bundles_post_ra>
